<compile_context>
chip_gen: v6e
topology: v6e:2x2x1
jax: 0.10.0
libtpu: 0.0.40
codegen_flags: <defaults>
</compile_context>

<pallas_src>
import jax
import jax.numpy as jnp
from jax.experimental import pallas as pl
from jax.experimental.pallas import tpu as pltpu

EPS = 1e-5
GROWTH = 32
BN_SIZE = 4
BLOCK_CONFIG = (6, 12, 24, 16)
NUM_INIT = 64
CLASS_COUNT = 14
VMEM_LIMIT = 48 * 1024 * 1024          # safe under v7x's 64 MiB physical VMEM


def _round_up(v, m):
    return -(-v // m) * m


def _choose_tk(K):
    """K tile: full K when small, else the largest 128-multiple divisor <=512."""
    if K <= 512:
        return K
    for cand in range(512, 127, -128):
        if K % cand == 0:
            return cand
    return K            # ragged large K: single full-K block (still < ~2.5 MB)


# ----------------------- fused (BN+ReLU) matmul kernel -----------------------

def _matmul_kernel_factory(has_pro, has_epi, has_bias, out_dtype):
    def kernel(*refs):
        i = 0
        a_ref, b_ref = refs[i], refs[i + 1]
        i += 2
        if has_pro:
            ps_ref, pb_ref = refs[i], refs[i + 1]
            i += 2
        if has_epi:
            es_ref, eb_ref = refs[i], refs[i + 1]
            i += 2
        if has_bias:
            bias_ref = refs[i]
            i += 1
        out_ref, acc_ref = refs[i], refs[i + 1]

        @pl.when(pl.program_id(2) == 0)
        def _init():
            acc_ref[...] = jnp.zeros_like(acc_ref)

        a = a_ref[...]
        if has_pro:          # pre-conv BatchNorm + ReLU on the input tile
            a = jnp.maximum(a.astype(jnp.float32) * ps_ref[...] + pb_ref[...], 0.0)
            a = a.astype(jnp.bfloat16)
        acc_ref[...] += jnp.dot(a, b_ref[...], preferred_element_type=jnp.float32)

        @pl.when(pl.program_id(2) == pl.num_programs(2) - 1)
        def _finalize():
            r = acc_ref[...]
            if has_bias:
                r = r + bias_ref[...]
            if has_epi:      # post-conv BatchNorm + ReLU epilogue
                r = jnp.maximum(r * es_ref[...] + eb_ref[...], 0.0)
            out_ref[...] = r.astype(out_dtype)

    return kernel


def fused_matmul(a, b, *, prologue=None, epilogue=None, bias=None,
                 out_dtype=jnp.bfloat16):
    """out = [epilogue]( [prologue](a) @ b [+ bias] ).

    a: (M, K), b: (K, N) bf16.  prologue/epilogue = (scale, shift) row vectors
    applied as relu(x*scale+shift); prologue per-K column of `a`, epilogue
    per-N column of the result.  Tiled + pipelined over (M, N, K)."""
    M, K = a.shape
    K2, N = b.shape
    assert K == K2
    a = a.astype(jnp.bfloat16)

    tm = min(512, _round_up(M, 8))
    Mp = _round_up(M, tm)
    if Mp != M:
        a = jnp.pad(a, ((0, Mp - M), (0, 0)))
    tk = _choose_tk(K)
    nk = K // tk
    if N % 128 == 0:
        tn = 256 if N % 256 == 0 else 128
    else:
        tn = N                          # small / ragged N: one full-width block
    grid = (Mp // tm, N // tn, nk)

    in_specs = [pl.BlockSpec((tm, tk), lambda m, n, k: (m, k)),
                pl.BlockSpec((tk, tn), lambda m, n, k: (k, n))]
    operands = [a, b]
    if prologue is not None:
        ps, pb = prologue
        in_specs += [pl.BlockSpec((1, tk), lambda m, n, k: (0, k)),
                     pl.BlockSpec((1, tk), lambda m, n, k: (0, k))]
        operands += [ps, pb]
    if epilogue is not None:
        es, eb = epilogue
        in_specs += [pl.BlockSpec((1, tn), lambda m, n, k: (0, n)),
                     pl.BlockSpec((1, tn), lambda m, n, k: (0, n))]
        operands += [es, eb]
    if bias is not None:
        in_specs.append(pl.BlockSpec((1, tn), lambda m, n, k: (0, n)))
        operands.append(bias)

    out_bytes = jnp.dtype(out_dtype).itemsize
    out = pl.pallas_call(
        _matmul_kernel_factory(prologue is not None, epilogue is not None,
                               bias is not None, out_dtype),
        out_shape=jax.ShapeDtypeStruct((Mp, N), out_dtype),
        grid=grid,
        in_specs=in_specs,
        out_specs=pl.BlockSpec((tm, tn), lambda m, n, k: (m, n)),
        scratch_shapes=[pltpu.VMEM((tm, tn), jnp.float32)],
        compiler_params=pltpu.CompilerParams(
            dimension_semantics=("parallel", "parallel", "arbitrary"),
            vmem_limit_bytes=VMEM_LIMIT),
        cost_estimate=pl.CostEstimate(
            flops=2 * Mp * N * K, transcendentals=0,
            bytes_accessed=Mp * K * 2 + K * N * 2 + Mp * N * out_bytes),
    )(*operands)
    return out[:M] if Mp != M else out


# --------------------------- pooling reduce kernels --------------------------

def _make_reduce_kernel(op):
    def kernel(x_ref, o_ref):
        x = x_ref[...]
        if op == "max":
            o_ref[...] = jnp.max(x, axis=0)
        else:
            o_ref[...] = jnp.mean(x.astype(jnp.float32), axis=0).astype(o_ref.dtype)
    return kernel


def pallas_reduce(stacked, op):
    """Reduce (R, M, C) -> (M, C) over the leading axis, tiled over M rows."""
    R, M, C = stacked.shape
    tm = min(1024, _round_up(M, 8))
    Mp = _round_up(M, tm)
    if Mp != M:
        stacked = jnp.pad(stacked, ((0, 0), (0, Mp - M), (0, 0)))
    elem = jnp.dtype(stacked.dtype).itemsize
    out = pl.pallas_call(
        _make_reduce_kernel(op),
        out_shape=jax.ShapeDtypeStruct((Mp, C), stacked.dtype),
        grid=(Mp // tm,),
        in_specs=[pl.BlockSpec((R, tm, C), lambda i: (0, i, 0))],
        out_specs=pl.BlockSpec((tm, C), lambda i: (i, 0)),
        compiler_params=pltpu.CompilerParams(
            dimension_semantics=("parallel",), vmem_limit_bytes=VMEM_LIMIT),
        cost_estimate=pl.CostEstimate(
            flops=R * Mp * C, transcendentals=0,
            bytes_accessed=(R + 1) * Mp * C * elem),
    )(stacked)
    return out[:M] if Mp != M else out


def _global_pool_kernel(x_ref, s_ref, b_ref, o_ref):
    x = x_ref[...].astype(jnp.float32)                       # (N, HW, C)
    r = jnp.maximum(x * s_ref[...] + b_ref[...], 0.0)        # fused norm5 + relu
    o_ref[...] = jnp.mean(r, axis=1)


def global_pool_bn_relu(x, bn):
    """relu(BN(x)) -> adaptive_avg_pool2d((1,1)) -> flatten, in one kernel."""
    N, H, W, C = x.shape
    scale, shift = bn                                        # (1, C) f32 each
    xr = x.reshape(N, H * W, C)
    return pl.pallas_call(
        _global_pool_kernel,
        out_shape=jax.ShapeDtypeStruct((N, C), jnp.float32),
        grid=(1,),
        in_specs=[pl.BlockSpec((N, H * W, C), lambda i: (0, 0, 0)),
                  pl.BlockSpec((1, 1, C), lambda i: (0, 0, 0)),
                  pl.BlockSpec((1, 1, C), lambda i: (0, 0, 0))],
        out_specs=pl.BlockSpec((N, C), lambda i: (0, 0)),
        compiler_params=pltpu.CompilerParams(
            dimension_semantics=("arbitrary",), vmem_limit_bytes=VMEM_LIMIT),
        cost_estimate=pl.CostEstimate(
            flops=4 * N * H * W * C, transcendentals=0,
            bytes_accessed=N * H * W * C * 2 + N * C * 4),
    )(xr, scale.reshape(1, 1, C), shift.reshape(1, 1, C))


# ------------------------------- conv / pool glue -----------------------------

def _im2col(x, kh, kw, stride, padding):
    """Pure slicing/concat glue; the matmul runs in Pallas."""
    # TODO(synk): 3x3 taps are still materialized via im2col in HBM; a halo'd
    # manual-DMA tap-streaming kernel would cut A-side traffic ~9x.
    N, H, W, Cin = x.shape
    Ho = (H + 2 * padding - kh) // stride + 1
    Wo = (W + 2 * padding - kw) // stride + 1
    if kh == 1 and kw == 1 and padding == 0:
        a = x[:, ::stride, ::stride, :].reshape(-1, Cin)
    else:
        xp = jnp.pad(x, ((0, 0), (padding, padding), (padding, padding), (0, 0)))
        patches = [xp[:, dy:dy + (Ho - 1) * stride + 1:stride,
                         dx:dx + (Wo - 1) * stride + 1:stride, :]
                   for dy in range(kh) for dx in range(kw)]
        a = jnp.concatenate(patches, axis=-1).reshape(-1, kh * kw * Cin)
    return a, Ho, Wo


def conv2d(x, cp, *, stride=1, padding=0, prologue=None, epilogue=None):
    N = x.shape[0]
    a, Ho, Wo = _im2col(x.astype(jnp.bfloat16), cp["kh"], cp["kw"], stride, padding)
    out = fused_matmul(a, cp["w"], prologue=prologue, epilogue=epilogue,
                       out_dtype=jnp.bfloat16)
    return out.reshape(N, Ho, Wo, cp["cout"])


def maxpool_3x3_s2_p1(x):
    N, H, W, C = x.shape
    Ho = (H + 2 - 3) // 2 + 1
    Wo = (W + 2 - 3) // 2 + 1
    xp = jnp.pad(x, ((0, 0), (1, 1), (1, 1), (0, 0)), constant_values=-jnp.inf)
    slabs = [xp[:, dy:dy + (Ho - 1) * 2 + 1:2, dx:dx + (Wo - 1) * 2 + 1:2, :]
             for dy in range(3) for dx in range(3)]
    stacked = jnp.stack(slabs, axis=0).reshape(9, N * Ho * Wo, C)
    return pallas_reduce(stacked, "max").reshape(N, Ho, Wo, C)


def avgpool_2x2_s2(x):
    N, H, W, C = x.shape
    slabs = [x[:, dy::2, dx::2, :] for dy in range(2) for dx in range(2)]
    stacked = jnp.stack(slabs, axis=0).reshape(4, N * (H // 2) * (W // 2), C)
    return pallas_reduce(stacked, "mean").reshape(N, H // 2, W // 2, C)


# ------------------------------ parameters -----------------------------------

def conv_init(key, cout, cin, kh, kw):
    fan_in = cin * kh * kw
    std = (2.0 / fan_in) ** 0.5
    return std * jax.random.normal(key, (cout, cin, kh, kw), jnp.float32)


def bn_init(c):
    return (jnp.ones((c,), jnp.float32), jnp.zeros((c,), jnp.float32),
            jnp.zeros((c,), jnp.float32), jnp.ones((c,), jnp.float32))


def init_params(key, class_count):
    keys = iter(jax.random.split(key, 256))
    p = {"conv0": conv_init(next(keys), NUM_INIT, 3, 7, 7),
         "norm0": bn_init(NUM_INIT)}
    nf = NUM_INIT
    blocks = []
    for bi, n_layers in enumerate(BLOCK_CONFIG):
        layers = []
        for li in range(n_layers):
            cin = nf + li * GROWTH
            layers.append({
                "norm1": bn_init(cin),
                "conv1": conv_init(next(keys), BN_SIZE * GROWTH, cin, 1, 1),
                "norm2": bn_init(BN_SIZE * GROWTH),
                "conv2": conv_init(next(keys), GROWTH, BN_SIZE * GROWTH, 3, 3),
            })
        nf += n_layers * GROWTH
        block = {"layers": layers}
        if bi != len(BLOCK_CONFIG) - 1:
            block["trans_norm"] = bn_init(nf)
            block["trans_conv"] = conv_init(next(keys), nf // 2, nf, 1, 1)
            nf //= 2
        blocks.append(block)
    p["blocks"] = blocks
    p["norm5"] = bn_init(nf)                 # nf == 1024 == classifier.in_features
    kw_, kb = jax.random.split(next(keys))
    bound = 1.0 / (nf ** 0.5)
    p["fc_w"] = jax.random.uniform(kw_, (class_count, nf), jnp.float32, -bound, bound)
    p["fc_b"] = jax.random.uniform(kb, (class_count,), jnp.float32, -bound, bound)
    return p


def _prep_conv(w):
    cout, cin, kh, kw = w.shape
    wmat = jnp.transpose(w, (2, 3, 1, 0)).reshape(kh * kw * cin, cout)
    return {"w": wmat.astype(jnp.bfloat16), "kh": kh, "kw": kw,
            "cin": cin, "cout": cout}


def _prep_bn(bn):
    # TODO(synk): BatchNorm uses running-statistics (inference) semantics;
    # training-mode batch statistics are not implemented.
    gamma, beta, mean, var = bn
    scale = gamma / jnp.sqrt(var + EPS)
    shift = beta - mean * scale
    return (scale.reshape(1, -1).astype(jnp.float32),
            shift.reshape(1, -1).astype(jnp.float32))


def prepare_params(p):
    """Hoist all constant folding out of the forward: pre-transposed bf16
    weight matrices and precomputed BN scale/shift."""
    q = {"conv0": _prep_conv(p["conv0"]), "norm0": _prep_bn(p["norm0"])}
    blocks = []
    for blk in p["blocks"]:
        nb = {"layers": [{"norm1": _prep_bn(l["norm1"]),
                          "conv1": _prep_conv(l["conv1"]),
                          "norm2": _prep_bn(l["norm2"]),
                          "conv2": _prep_conv(l["conv2"])} for l in blk["layers"]]}
        if "trans_conv" in blk:
            nb["trans_norm"] = _prep_bn(blk["trans_norm"])
            nb["trans_conv"] = _prep_conv(blk["trans_conv"])
        blocks.append(nb)
    q["blocks"] = blocks
    q["norm5"] = _prep_bn(p["norm5"])
    q["fc_w"] = jnp.transpose(p["fc_w"]).astype(jnp.bfloat16)   # (1024, classes)
    q["fc_b"] = p["fc_b"].reshape(1, -1).astype(jnp.float32)
    return q


# -------------------------------- forward ------------------------------------

def densenet121_forward(p, x_nchw):
    # NCHW (PyTorch) -> NHWC (kernel layout), bf16 activations throughout.
    x = jnp.transpose(x_nchw, (0, 2, 3, 1)).astype(jnp.bfloat16)

    # stem: conv0 (+ fused norm0/relu0 epilogue) -> maxpool
    x = conv2d(x, p["conv0"], stride=2, padding=3, epilogue=p["norm0"])
    x = maxpool_3x3_s2_p1(x)

    # dense blocks + transitions
    for block in p["blocks"]:
        for layer in block["layers"]:
            # norm1/relu1 fused as prologue, norm2/relu2 fused as epilogue
            y = conv2d(x, layer["conv1"],
                       prologue=layer["norm1"], epilogue=layer["norm2"])
            y = conv2d(y, layer["conv2"], padding=1)          # 3x3, growth=32
            # TODO(synk): dense concat could instead write into a preallocated
            # channel slab via out_specs offsets + input_output_aliases.
            x = jnp.concatenate([x, y], axis=-1)
        if "trans_conv" in block:
            # transition norm/relu fused as prologue of the 1x1 conv
            x = conv2d(x, block["trans_conv"], prologue=block["trans_norm"])
            x = avgpool_2x2_s2(x)

    # norm5 -> relu -> adaptive avg pool (1,1) (fused) -> classifier
    feat = global_pool_bn_relu(x, p["norm5"])                 # (N, 1024) f32
    logits = fused_matmul(feat.astype(jnp.bfloat16), p["fc_w"],
                          bias=p["fc_b"], out_dtype=jnp.float32)
    return logits


# --------------------------------- main ---------------------------------------

if __name__ == "__main__":
    key = jax.random.PRNGKey(0)
    k_param, k_input = jax.random.split(key)
    params = init_params(k_param, CLASS_COUNT)
    prepped = prepare_params(params)
    # Small input consistent with the module: NCHW, 3 input channels.
    x = jax.random.normal(k_input, (2, 3, 32, 32), jnp.float32)

    logits = densenet121_forward(prepped, x)
    logits = jax.block_until_ready(logits)

    assert logits.shape == (2, CLASS_COUNT), logits.shape
    assert jnp.all(jnp.isfinite(logits))
    print("KERNEL_OK")
</pallas_src>

<mosaic_0001>
module attributes {stable_mosaic.version = 11 : i64} {
  func.func @kernel(%arg0: i32, %arg1: i32, %arg2: i32, %arg3: memref<512x147xbf16, #tpu.memory_space<vmem>>, %arg4: memref<147x64xbf16, #tpu.memory_space<vmem>>, %arg5: memref<1x64xf32, #tpu.memory_space<vmem>>, %arg6: memref<1x64xf32, #tpu.memory_space<vmem>>, %arg7: memref<512x64xbf16, #tpu.memory_space<vmem>>, %arg8: memref<512x64xf32, #tpu.memory_space<vmem>>) attributes {dimension_semantics = [#tpu.dimension_semantics<parallel>, #tpu.dimension_semantics<parallel>, #tpu.dimension_semantics<arbitrary>], iteration_bounds = array<i64: 1, 1, 1>, scalar_prefetch = 0 : i64, scratch_operands = 1 : i64, tpu.core_type = #tpu.core_type<tc>, window_params = [{transform_indices = @transform_0, window_bounds = array<i64: 512, 147>}, {transform_indices = @transform_1, window_bounds = array<i64: 147, 64>}, {transform_indices = @transform_2, window_bounds = array<i64: 1, 64>}, {transform_indices = @transform_3, window_bounds = array<i64: 1, 64>}, {transform_indices = @transform_4, window_bounds = array<i64: 512, 64>}]} {
    %c0_i32 = arith.constant 0 : i32
    %0 = arith.cmpi eq, %arg2, %c0_i32 : i32
    %1 = arith.extui %0 : i1 to i32
    %c0_i32_0 = arith.constant 0 : i32
    %2 = arith.cmpi ne, %1, %c0_i32_0 : i32
    scf.if %2 {
      %cst_10 = arith.constant 0.000000e+00 : f32
      %12 = vector.broadcast %cst_10 : f32 to vector<512x64xf32>
      %c0_11 = arith.constant 0 : index
      %c0_12 = arith.constant 0 : index
      %13 = vector.load %arg8[%c0_11, %c0_12] : memref<512x64xf32, #tpu.memory_space<vmem>>, vector<512x64xf32>
      tpu.vector_store %arg8[%c0_11, %c0_12], %12 {strides = array<i32>} : memref<512x64xf32, #tpu.memory_space<vmem>>, vector<512x64xf32>,
    } else {
    }
    %c0 = arith.constant 0 : index
    %c0_1 = arith.constant 0 : index
    %3 = vector.load %arg3[%c0, %c0_1] : memref<512x147xbf16, #tpu.memory_space<vmem>>, vector<512x147xbf16>
    %c0_2 = arith.constant 0 : index
    %c0_3 = arith.constant 0 : index
    %4 = vector.load %arg8[%c0_2, %c0_3] : memref<512x64xf32, #tpu.memory_space<vmem>>, vector<512x64xf32>
    %c0_4 = arith.constant 0 : index
    %c0_5 = arith.constant 0 : index
    %5 = vector.load %arg4[%c0_4, %c0_5] : memref<147x64xbf16, #tpu.memory_space<vmem>>, vector<147x64xbf16>
    %cst = arith.constant dense<0.000000e+00> : vector<512x64xf32>
    %6 = tpu.matmul %3, %5, %cst {dimension_numbers = #tpu.dot_dimension_numbers<[1], [0], [0], [1], [0, 0, 1, 1], [], []>} : vector<512x147xbf16>, vector<147x64xbf16>, vector<512x64xf32> -> vector<512x64xf32>
    %7 = arith.addf %4, %6 : vector<512x64xf32>
    %c0_6 = arith.constant 0 : index
    %c0_7 = arith.constant 0 : index
    %8 = vector.load %arg8[%c0_6, %c0_7] : memref<512x64xf32, #tpu.memory_space<vmem>>, vector<512x64xf32>
    tpu.vector_store %arg8[%c0_6, %c0_7], %7 {strides = array<i32>} : memref<512x64xf32, #tpu.memory_space<vmem>>, vector<512x64xf32>,
    %c0_i32_8 = arith.constant 0 : i32
    %9 = arith.cmpi eq, %arg2, %c0_i32_8 : i32
    %10 = arith.extui %9 : i1 to i32
    %c0_i32_9 = arith.constant 0 : i32
    %11 = arith.cmpi ne, %10, %c0_i32_9 : i32
    scf.if %11 {
      %c0_10 = arith.constant 0 : index
      %c0_11 = arith.constant 0 : index
      %12 = vector.load %arg8[%c0_10, %c0_11] : memref<512x64xf32, #tpu.memory_space<vmem>>, vector<512x64xf32>
      %c0_12 = arith.constant 0 : index
      %c0_13 = arith.constant 0 : index
      %13 = vector.load %arg5[%c0_12, %c0_13] : memref<1x64xf32, #tpu.memory_space<vmem>>, vector<1x64xf32>
      %14 = vector.broadcast %13 : vector<1x64xf32> to vector<512x64xf32>
      %15 = arith.mulf %12, %14 : vector<512x64xf32>
      %c0_14 = arith.constant 0 : index
      %c0_15 = arith.constant 0 : index
      %16 = vector.load %arg6[%c0_14, %c0_15] : memref<1x64xf32, #tpu.memory_space<vmem>>, vector<1x64xf32>
      %17 = vector.broadcast %16 : vector<1x64xf32> to vector<512x64xf32>
      %18 = arith.addf %15, %17 : vector<512x64xf32>
      %cst_16 = arith.constant 0.000000e+00 : f32
      %19 = vector.broadcast %cst_16 : f32 to vector<512x64xf32>
      %20 = arith.maximumf %18, %19 : vector<512x64xf32>
      %21 = arith.truncf %20 : vector<512x64xf32> to vector<512x64xbf16>
      %c0_17 = arith.constant 0 : index
      %c0_18 = arith.constant 0 : index
      %22 = vector.load %arg7[%c0_17, %c0_18] : memref<512x64xbf16, #tpu.memory_space<vmem>>, vector<512x64xbf16>
      tpu.vector_store %arg7[%c0_17, %c0_18], %21 {strides = array<i32>} : memref<512x64xbf16, #tpu.memory_space<vmem>>, vector<512x64xbf16>,
    } else {
    }
    return
  }
  func.func @transform_0(%arg0: i32, %arg1: i32, %arg2: i32) -> (i32, i32) {
    %c0_i32 = arith.constant 0 : i32
    return %arg0, %arg2 : i32, i32
  }
  func.func @transform_1(%arg0: i32, %arg1: i32, %arg2: i32) -> (i32, i32) {
    %c0_i32 = arith.constant 0 : i32
    return %arg2, %arg1 : i32, i32
  }
  func.func @transform_2(%arg0: i32, %arg1: i32, %arg2: i32) -> (i32, i32) {
    %c0_i32 = arith.constant 0 : i32
    %c0_i32_0 = arith.constant 0 : i32
    return %c0_i32, %arg1 : i32, i32
  }
  func.func @transform_3(%arg0: i32, %arg1: i32, %arg2: i32) -> (i32, i32) {
    %c0_i32 = arith.constant 0 : i32
    %c0_i32_0 = arith.constant 0 : i32
    return %c0_i32, %arg1 : i32, i32
  }
  func.func @transform_4(%arg0: i32, %arg1: i32, %arg2: i32) -> (i32, i32) {
    %c0_i32 = arith.constant 0 : i32
    return %arg0, %arg1 : i32, i32
  }
}

</mosaic_0001>

<bundles_post_ra>
// kernel: tpu_custom_call.1
= control target key start
LH: loop header
LB: loop body
LE: loop exit
PB: predicated region body
PF: predicated region fallthrough
CT: control target
= control target key end

     0   :  { %v2066_v0 = vmov 0   ;;  %vm579_vm0 = vcmask 154624   ;;  %vm676_vm1 = vcmask 1040384   ;;  %vm677_vm2 = vcmask 1041408   ;;  %s2948_s1 = inlined_call_operand.vmem [shape: bf16[147,64], index: 1, kind: input, shape index: {}]   ;;  %s2949_s0 = inlined_call_operand.vmem [shape: bf16[512,147], index: 0, kind: input, shape index: {}]   ;;  %s2950_s2 = inlined_call_operand.vmem [shape: f32[1,64], index: 2, kind: input, shape index: {}]   ;;  %s2951_s3 = inlined_call_operand.vmem [shape: f32[1,64], index: 3, kind: input, shape index: {}]   ;;  %s2952_s4 = inlined_call_operand.vmem [shape: bf16[512,64], index: 4, kind: output, shape index: {}]  }
   0x1   :  { %683 = vmatprep.subr.bf16.mxu0 %v2066_v0  ;;  %1935 = vmatprep.subr.bf16.mxu1 %v2066_v0  ;;  %v1958_v1 = vld [vmem:[%s2948_s1 + $0x38] sm:$0xff]   ;;  %v1959_v2 = vld [vmem:[%s2948_s1 + $0x30] sm:$0xff]   ;;  %v1960_v3 = vld [vmem:[%s2948_s1 + $0x28] sm:$0xff]   ;;  %v2067_v10 = vmov 65535   ;;  %vm22_vm3 = vcmask 523264   ;;  %v2068_v17 = vmov 0.0  }
   0x2   :  { %684 = vmatpush1.bf16.msra.mxu0 %v1958_v1  ;;  %1945 = vmatpush1.bf16.msra.mxu1 %v1958_v1  ;;  %v1961_v4 = vld [vmem:[%s2948_s1 + $0x20] sm:$0xff]   ;;  %v1962_v7 = vld [vmem:[%s2948_s1 + $0x18] sm:$0xff]   ;;  %v1963_v8 = vld [vmem:[%s2948_s1 + $0x10] sm:$0xff]   ;;  %v678_v11 = vsel %vm676_vm1, 4294967295, %v2067_v10  ;;  %23 = vst.msk [vmem:[#allocation2] sm:$0xff] %vm22_vm3, %v2068_v17  ;;  %vm1630_vm4 = vcmask 519168  }
   0x3   :  { %685 = vmatprep.subr.bf16.mxu0 %v2066_v0  ;;  %1936 = vmatprep.subr.bf16.mxu1 %v2066_v0  ;;  %v1970_v5 = vld [vmem:[%s2949_s0 + $0x4] ss:$8 sps:$4 sm:$0xff]   ;;  %v1966_v13 = vld [vmem:[%s2948_s1 + $0x48] ss:$0 sps:$4 sm:$0x33]   ;;  %v679_v14 = vsel %vm677_vm2, %v678_v11, 0 }
   0x4   :  { %1773 = vmatprep.mubr.msk.bf16.mxu0 %vm579_vm0, %v1970_v5  ;;  %v1973_v6 = vld [vmem:[%s2949_s0 + $0x104] ss:$8 sps:$4 sm:$0xff]   ;;  %v681_v15 = vand.u32 %v1966_v13, %v679_v14  ;;  %24 = vst.msk [vmem:[#allocation2 + $0x8] sm:$0xff] %vm22_vm3, %v2068_v17  ;;  %25 = vst.msk [vmem:[#allocation2 + $0x10] sm:$0xff] %vm22_vm3, %v2068_v17  ;;  %v1968_v18 = vld [vmem:[%s2949_s0] ss:$8 sps:$4 sm:$0xff]  }
   0x5   :  { %1789 = vmatprep.mubr.msk.bf16.mxu1 %vm579_vm0, %v1973_v6  ;;  %v1964_v9 = vld [vmem:[%s2948_s1 + $0x8] sm:$0xff]   ;;  %v1965_v12 = vld [vmem:[%s2948_s1] sm:$0xff]   ;;  %26 = vst.msk [vmem:[#allocation2 + $0x18] sm:$0xff] %vm22_vm3, %v2068_v17  ;;  %27 = vst.msk [vmem:[#allocation2 + $0x20] sm:$0xff] %vm22_vm3, %v2068_v17 }
   0x6   :  { %686 = vmatpush1.bf16.msra.mxu0 %v1959_v2  ;;  %1946 = vmatpush1.bf16.msra.mxu1 %v1959_v2  ;;  %v2132_v16 = vld [vmem:[%s2948_s1 + $0x40] sm:$0xff]   ;;  %28 = vst.msk [vmem:[#allocation2 + $0x28] sm:$0xff] %vm22_vm3, %v2068_v17  ;;  %29 = vst.msk [vmem:[#allocation2 + $0x30] sm:$0xff] %vm22_vm3, %v2068_v17  ;;  %v1974_v20 = vld [vmem:[%s2949_s0 + $0x14] ss:$8 sps:$4 sm:$0xff]  }
   0x7   :  { %687 = vmatprep.subr.bf16.mxu0 %v2066_v0  ;;  %1937 = vmatprep.subr.bf16.mxu1 %v2066_v0  ;;  %30 = vst.msk [vmem:[#allocation2 + $0x38] sm:$0xff] %vm22_vm3, %v2068_v17  ;;  %31 = vst.msk [vmem:[#allocation2 + $0x40] sm:$0xff] %vm22_vm3, %v2068_v17  ;;  %v1971_v19 = vld [vmem:[%s2949_s0 + $0x100] ss:$8 sps:$4 sm:$0xff]   ;;  %v1976_v21 = vld [vmem:[%s2949_s0 + $0x114] ss:$8 sps:$4 sm:$0xff]  }
   0x8   :  { %32 = vst.msk [vmem:[#allocation2 + $0x48] sm:$0xff] %vm22_vm3, %v2068_v17  ;;  %33 = vst.msk [vmem:[#allocation2 + $0x50] sm:$0xff] %vm22_vm3, %v2068_v17  ;;  %v1978_v22 = vld [vmem:[%s2949_s0 + $0x10] ss:$8 sps:$4 sm:$0xff]   ;;  %v1980_v24 = vld [vmem:[%s2949_s0 + $0x24] ss:$8 sps:$4 sm:$0xff]  }
   0x9   :  { %34 = vst.msk [vmem:[#allocation2 + $0x58] sm:$0xff] %vm22_vm3, %v2068_v17  ;;  %35 = vst.msk [vmem:[#allocation2 + $0x60] sm:$0xff] %vm22_vm3, %v2068_v17  ;;  %v1979_v23 = vld [vmem:[%s2949_s0 + $0x110] ss:$8 sps:$4 sm:$0xff]   ;;  %v1982_v25 = vld [vmem:[%s2949_s0 + $0x124] ss:$8 sps:$4 sm:$0xff]  }
   0xa   :  { %688 = vmatpush1.bf16.msra.mxu0 %v1960_v3  ;;  %1947 = vmatpush1.bf16.msra.mxu1 %v1960_v3  ;;  %36 = vst.msk [vmem:[#allocation2 + $0x68] sm:$0xff] %vm22_vm3, %v2068_v17  ;;  %37 = vst.msk [vmem:[#allocation2 + $0x70] sm:$0xff] %vm22_vm3, %v2068_v17  ;;  %v1984_v26 = vld [vmem:[%s2949_s0 + $0x20] ss:$8 sps:$4 sm:$0xff]   ;;  %v1986_v28 = vld [vmem:[%s2949_s0 + $0x34] ss:$8 sps:$4 sm:$0xff]  }
   0xb   :  { %689 = vmatprep.subr.bf16.mxu0 %v2066_v0  ;;  %1938 = vmatprep.subr.bf16.mxu1 %v2066_v0  ;;  %38 = vst.msk [vmem:[#allocation2 + $0x78] sm:$0xff] %vm22_vm3, %v2068_v17  ;;  %39 = vst.msk [vmem:[#allocation2 + $0x80] sm:$0xff] %vm22_vm3, %v2068_v17  ;;  %v1985_v27 = vld [vmem:[%s2949_s0 + $0x120] ss:$8 sps:$4 sm:$0xff]   ;;  %v1988_v29 = vld [vmem:[%s2949_s0 + $0x134] ss:$8 sps:$4 sm:$0xff]  }
   0xc   :  { %40 = vst.msk [vmem:[#allocation2 + $0x88] sm:$0xff] %vm22_vm3, %v2068_v17  ;;  %41 = vst.msk [vmem:[#allocation2 + $0x90] sm:$0xff] %vm22_vm3, %v2068_v17  ;;  %v1990_v30 = vld [vmem:[%s2949_s0 + $0x30] ss:$8 sps:$4 sm:$0xff]   ;;  %v1992_v32 = vld [vmem:[%s2949_s0 + $0x44] ss:$8 sps:$4 sm:$0xff]  }
   0xd   :  { %42 = vst.msk [vmem:[#allocation2 + $0x98] sm:$0xff] %vm22_vm3, %v2068_v17  ;;  %43 = vst.msk [vmem:[#allocation2 + $0xa0] sm:$0xff] %vm22_vm3, %v2068_v17  ;;  %v1991_v31 = vld [vmem:[%s2949_s0 + $0x130] ss:$8 sps:$4 sm:$0xff]   ;;  %v1994_v33 = vld [vmem:[%s2949_s0 + $0x144] ss:$8 sps:$4 sm:$0xff]  }
   0xe   :  { %690 = vmatpush1.bf16.msra.mxu0 %v1961_v4  ;;  %1948 = vmatpush1.bf16.msra.mxu1 %v1961_v4  ;;  %44 = vst.msk [vmem:[#allocation2 + $0xa8] sm:$0xff] %vm22_vm3, %v2068_v17  ;;  %45 = vst.msk [vmem:[#allocation2 + $0xb0] sm:$0xff] %vm22_vm3, %v2068_v17  ;;  %v1996_v34 = vld [vmem:[%s2949_s0 + $0x40] ss:$8 sps:$4 sm:$0xff]   ;;  %v1998_v36 = vld [vmem:[%s2949_s0 + $0x54] ss:$8 sps:$4 sm:$0xff]  }
   0xf   :  { %691 = vmatprep.subr.bf16.mxu0 %v2066_v0  ;;  %1939 = vmatprep.subr.bf16.mxu1 %v2066_v0  ;;  %46 = vst.msk [vmem:[#allocation2 + $0xb8] sm:$0xff] %vm22_vm3, %v2068_v17  ;;  %47 = vst.msk [vmem:[#allocation2 + $0xc0] sm:$0xff] %vm22_vm3, %v2068_v17  ;;  %v1997_v35 = vld [vmem:[%s2949_s0 + $0x140] ss:$8 sps:$4 sm:$0xff]   ;;  %v2000_v37 = vld [vmem:[%s2949_s0 + $0x154] ss:$8 sps:$4 sm:$0xff]  }
  0x10   :  { %48 = vst.msk [vmem:[#allocation2 + $0xc8] sm:$0xff] %vm22_vm3, %v2068_v17  ;;  %49 = vst.msk [vmem:[#allocation2 + $0xd0] sm:$0xff] %vm22_vm3, %v2068_v17  ;;  %v2002_v38 = vld [vmem:[%s2949_s0 + $0x50] ss:$8 sps:$4 sm:$0xff]   ;;  %v2004_v40 = vld [vmem:[%s2949_s0 + $0x64] ss:$8 sps:$4 sm:$0xff]  }
  0x11   :  { %50 = vst.msk [vmem:[#allocation2 + $0xd8] sm:$0xff] %vm22_vm3, %v2068_v17  ;;  %51 = vst.msk [vmem:[#allocation2 + $0xe0] sm:$0xff] %vm22_vm3, %v2068_v17  ;;  %v2003_v39 = vld [vmem:[%s2949_s0 + $0x150] ss:$8 sps:$4 sm:$0xff]   ;;  %v2006_v41 = vld [vmem:[%s2949_s0 + $0x164] ss:$8 sps:$4 sm:$0xff]  }
  0x12   :  { %692 = vmatpush1.bf16.msra.mxu0 %v1962_v7  ;;  %1949 = vmatpush1.bf16.msra.mxu1 %v1962_v7  ;;  %52 = vst.msk [vmem:[#allocation2 + $0xe8] sm:$0xff] %vm22_vm3, %v2068_v17  ;;  %53 = vst.msk [vmem:[#allocation2 + $0xf0] sm:$0xff] %vm22_vm3, %v2068_v17  ;;  %v2008_v42 = vld [vmem:[%s2949_s0 + $0x60] ss:$8 sps:$4 sm:$0xff]   ;;  %v2010_v44 = vld [vmem:[%s2949_s0 + $0x74] ss:$8 sps:$4 sm:$0xff]  }
  0x13   :  { %693 = vmatprep.subr.bf16.mxu0 %v2066_v0  ;;  %1940 = vmatprep.subr.bf16.mxu1 %v2066_v0  ;;  %54 = vst.msk [vmem:[#allocation2 + $0xf8] sm:$0xff] %vm22_vm3, %v2068_v17  ;;  %55 = vst.msk [vmem:[#allocation2 + $0x100] sm:$0xff] %vm22_vm3, %v2068_v17  ;;  %v2009_v43 = vld [vmem:[%s2949_s0 + $0x160] ss:$8 sps:$4 sm:$0xff]   ;;  %v2012_v45 = vld [vmem:[%s2949_s0 + $0x174] ss:$8 sps:$4 sm:$0xff]  }
  0x14   :  { %56 = vst.msk [vmem:[#allocation2 + $0x108] sm:$0xff] %vm22_vm3, %v2068_v17  ;;  %57 = vst.msk [vmem:[#allocation2 + $0x110] sm:$0xff] %vm22_vm3, %v2068_v17  ;;  %v2014_v46 = vld [vmem:[%s2949_s0 + $0x70] ss:$8 sps:$4 sm:$0xff]   ;;  %v2016_v48 = vld [vmem:[%s2949_s0 + $0x84] ss:$8 sps:$4 sm:$0xff]  }
  0x15   :  { %58 = vst.msk [vmem:[#allocation2 + $0x118] sm:$0xff] %vm22_vm3, %v2068_v17  ;;  %59 = vst.msk [vmem:[#allocation2 + $0x120] sm:$0xff] %vm22_vm3, %v2068_v17  ;;  %v2015_v47 = vld [vmem:[%s2949_s0 + $0x170] ss:$8 sps:$4 sm:$0xff]   ;;  %v2018_v49 = vld [vmem:[%s2949_s0 + $0x184] ss:$8 sps:$4 sm:$0xff]  }
  0x16   :  { %694 = vmatpush1.bf16.msra.mxu0 %v1963_v8  ;;  %1950 = vmatpush1.bf16.msra.mxu1 %v1963_v8  ;;  %60 = vst.msk [vmem:[#allocation2 + $0x128] sm:$0xff] %vm22_vm3, %v2068_v17  ;;  %61 = vst.msk [vmem:[#allocation2 + $0x130] sm:$0xff] %vm22_vm3, %v2068_v17  ;;  %v2020_v50 = vld [vmem:[%s2949_s0 + $0x80] ss:$8 sps:$4 sm:$0xff]   ;;  %v2022_v52 = vld [vmem:[%s2949_s0 + $0x94] ss:$8 sps:$4 sm:$0xff]  }
  0x17   :  { %695 = vmatprep.subr.bf16.mxu0 %v2066_v0  ;;  %1941 = vmatprep.subr.bf16.mxu1 %v2066_v0  ;;  %62 = vst.msk [vmem:[#allocation2 + $0x138] sm:$0xff] %vm22_vm3, %v2068_v17  ;;  %63 = vst.msk [vmem:[#allocation2 + $0x140] sm:$0xff] %vm22_vm3, %v2068_v17  ;;  %v2021_v51 = vld [vmem:[%s2949_s0 + $0x180] ss:$8 sps:$4 sm:$0xff]   ;;  %v2024_v53 = vld [vmem:[%s2949_s0 + $0x194] ss:$8 sps:$4 sm:$0xff]  }
  0x18   :  { %64 = vst.msk [vmem:[#allocation2 + $0x148] sm:$0xff] %vm22_vm3, %v2068_v17  ;;  %65 = vst.msk [vmem:[#allocation2 + $0x150] sm:$0xff] %vm22_vm3, %v2068_v17  ;;  %v2026_v54 = vld [vmem:[%s2949_s0 + $0x90] ss:$8 sps:$4 sm:$0xff]   ;;  %v2028_v56 = vld [vmem:[%s2949_s0 + $0xa4] ss:$8 sps:$4 sm:$0xff]  }
  0x19   :  { %66 = vst.msk [vmem:[#allocation2 + $0x158] sm:$0xff] %vm22_vm3, %v2068_v17  ;;  %67 = vst.msk [vmem:[#allocation2 + $0x160] sm:$0xff] %vm22_vm3, %v2068_v17  ;;  %v2027_v55 = vld [vmem:[%s2949_s0 + $0x190] ss:$8 sps:$4 sm:$0xff]   ;;  %v2030_v57 = vld [vmem:[%s2949_s0 + $0x1a4] ss:$8 sps:$4 sm:$0xff]  }
  0x1a   :  { %696 = vmatpush1.bf16.msra.mxu0 %v1964_v9  ;;  %1951 = vmatpush1.bf16.msra.mxu1 %v1964_v9  ;;  %68 = vst.msk [vmem:[#allocation2 + $0x168] sm:$0xff] %vm22_vm3, %v2068_v17  ;;  %69 = vst.msk [vmem:[#allocation2 + $0x170] sm:$0xff] %vm22_vm3, %v2068_v17  ;;  %v2032_v58 = vld [vmem:[%s2949_s0 + $0xa0] ss:$8 sps:$4 sm:$0xff]   ;;  %v2034_v60 = vld [vmem:[%s2949_s0 + $0xb4] ss:$8 sps:$4 sm:$0xff]  }
  0x1b   :  { %697 = vmatprep.subr.bf16.mxu0 %v2066_v0  ;;  %1942 = vmatprep.subr.bf16.mxu1 %v2066_v0  ;;  %70 = vst.msk [vmem:[#allocation2 + $0x178] sm:$0xff] %vm22_vm3, %v2068_v17  ;;  %71 = vst.msk [vmem:[#allocation2 + $0x180] sm:$0xff] %vm22_vm3, %v2068_v17  ;;  %v2033_v59 = vld [vmem:[%s2949_s0 + $0x1a0] ss:$8 sps:$4 sm:$0xff]   ;;  %v2036_v61 = vld [vmem:[%s2949_s0 + $0x1b4] ss:$8 sps:$4 sm:$0xff]  }
  0x1c   :  { %72 = vst.msk [vmem:[#allocation2 + $0x188] sm:$0xff] %vm22_vm3, %v2068_v17  ;;  %73 = vst.msk [vmem:[#allocation2 + $0x190] sm:$0xff] %vm22_vm3, %v2068_v17  ;;  %v2038_v62 = vld [vmem:[%s2949_s0 + $0xb0] ss:$8 sps:$4 sm:$0xff]   ;;  %v2042_v1 = vld [vmem:[%s2949_s0 + $0x1c4] ss:$8 sps:$4 sm:$0xff]  }
  0x1d   :  { %74 = vst.msk [vmem:[#allocation2 + $0x198] sm:$0xff] %vm22_vm3, %v2068_v17  ;;  %75 = vst.msk [vmem:[#allocation2 + $0x1a0] sm:$0xff] %vm22_vm3, %v2068_v17  ;;  %v2039_v63 = vld [vmem:[%s2949_s0 + $0x1b0] ss:$8 sps:$4 sm:$0xff]   ;;  %v2044_v2 = vld [vmem:[%s2949_s0 + $0xc0] ss:$8 sps:$4 sm:$0xff]  }
  0x1e   :  { %698 = vmatpush1.bf16.msra.mxu0 %v1965_v12  ;;  %1952 = vmatpush1.bf16.msra.mxu1 %v1965_v12  ;;  %76 = vst.msk [vmem:[#allocation2 + $0x1a8] sm:$0xff] %vm22_vm3, %v2068_v17  ;;  %77 = vst.msk [vmem:[#allocation2 + $0x1b0] sm:$0xff] %vm22_vm3, %v2068_v17  ;;  %v2045_v3 = vld [vmem:[%s2949_s0 + $0x1c0] ss:$8 sps:$4 sm:$0xff]   ;;  %v2046_v4 = vld [vmem:[%s2949_s0 + $0xd4] ss:$8 sps:$4 sm:$0xff]  }
  0x1f   :  { %711 = vmatprep.subr.bf16.mxu0 %v2066_v0  ;;  %1943 = vmatprep.subr.bf16.mxu1 %v2066_v0  ;;  %78 = vst.msk [vmem:[#allocation2 + $0x1b8] sm:$0xff] %vm22_vm3, %v2068_v17  ;;  %79 = vst.msk [vmem:[#allocation2 + $0x1c0] sm:$0xff] %vm22_vm3, %v2068_v17  ;;  %v2048_v5 = vld [vmem:[%s2949_s0 + $0x1d4] ss:$8 sps:$4 sm:$0xff]   ;;  %v2050_v6 = vld [vmem:[%s2949_s0 + $0xd0] ss:$8 sps:$4 sm:$0xff]  }
  0x20   :  { %80 = vst.msk [vmem:[#allocation2 + $0x1c8] sm:$0xff] %vm22_vm3, %v2068_v17  ;;  %81 = vst.msk [vmem:[#allocation2 + $0x1d0] sm:$0xff] %vm22_vm3, %v2068_v17  ;;  %v2051_v7 = vld [vmem:[%s2949_s0 + $0x1d0] ss:$8 sps:$4 sm:$0xff]   ;;  %v2052_v8 = vld [vmem:[%s2949_s0 + $0xe4] ss:$8 sps:$4 sm:$0xff]  }
  0x21   :  { %82 = vst.msk [vmem:[#allocation2 + $0x1d8] sm:$0xff] %vm22_vm3, %v2068_v17  ;;  %83 = vst.msk [vmem:[#allocation2 + $0x1e0] sm:$0xff] %vm22_vm3, %v2068_v17  ;;  %v2054_v9 = vld [vmem:[%s2949_s0 + $0x1e4] ss:$8 sps:$4 sm:$0xff]   ;;  %v2056_v10 = vld [vmem:[%s2949_s0 + $0xe0] ss:$8 sps:$4 sm:$0xff]  }
  0x22   :  { %712 = vmatpush2.bf16.msra.mxu0 %v681_v15  ;;  %1953 = vmatpush2.bf16.msra.mxu1 %v681_v15  ;;  %84 = vst.msk [vmem:[#allocation2 + $0x1e8] sm:$0xff] %vm22_vm3, %v2068_v17  ;;  %85 = vst.msk [vmem:[#allocation2 + $0x1f0] sm:$0xff] %vm22_vm3, %v2068_v17  ;;  %v2057_v11 = vld [vmem:[%s2949_s0 + $0x1e0] ss:$8 sps:$4 sm:$0xff]   ;;  %v2058_v12 = vld [vmem:[%s2949_s0 + $0xf4] ss:$8 sps:$4 sm:$0xff]  }
  0x23   :  { %713 = vmatprep.subr.bf16.mxu0 %v2066_v0  ;;  %1944 = vmatprep.subr.bf16.mxu1 %v2066_v0  ;;  %86 = vst.msk [vmem:[#allocation2 + $0x1f8] sm:$0xff] %vm22_vm3, %v2068_v17  ;;  %v2040_v0 = vld [vmem:[%s2949_s0 + $0xc4] ss:$8 sps:$4 sm:$0xff]   ;;  %v2060_v13 = vld [vmem:[%s2949_s0 + $0x1f4] ss:$8 sps:$4 sm:$0xff]  }
  0x24   :  { %v2062_v14 = vld [vmem:[%s2949_s0 + $0xf0] ss:$8 sps:$4 sm:$0xff]   ;;  %v183_v17 = vld [vmem:[#allocation2 + $0x100] sm:$0xff] }
  0x25   :  { %v2063_v15 = vld [vmem:[%s2949_s0 + $0x1f0] ss:$8 sps:$4 sm:$0xff]  }
  0x26   :  { %714 = vmatpush2.bf16.msra.mxu0 %v2132_v16  ;;  %1954 = vmatpush2.bf16.msra.mxu1 %v2132_v16  ;;  %v151_v16 = vld [vmem:[#allocation2] sm:$0xff] }
  0x29   :  { %716 = vmatmul.mubr.bf16.vlgmr.msra.gmra.mxu0 %v1968_v18  ;;  %844 = vmatmul.mubr.bf16.vlgmr.msra.gmra.mxu1 %v1971_v19 }
  0x2a   :  { %1774 = vmatprep.mubr.msk.bf16.mxu0 %vm579_vm0, %v1974_v20  ;;  %1790 = vmatprep.mubr.msk.bf16.mxu1 %vm579_vm0, %v1976_v21 }
  0x31   :  { %724 = vmatmul.mubr.bf16.gmra.mxu0 %v1978_v22  ;;  %852 = vmatmul.mubr.bf16.gmra.mxu1 %v1979_v23 }
  0x32   :  { %1775 = vmatprep.mubr.msk.bf16.mxu0 %vm579_vm0, %v1980_v24  ;;  %1791 = vmatprep.mubr.msk.bf16.mxu1 %vm579_vm0, %v1982_v25  ;;  %v152_v24 = vld [vmem:[#allocation2 + $0x8] sm:$0xff] }
  0x33   :  { %v184_v25 = vld [vmem:[#allocation2 + $0x108] sm:$0xff] }
  0x39   :  { %732 = vmatmul.mubr.bf16.gmra.mxu0 %v1984_v26  ;;  %860 = vmatmul.mubr.bf16.gmra.mxu1 %v1985_v27 }
  0x3a   :  { %1776 = vmatprep.mubr.msk.bf16.mxu0 %vm579_vm0, %v1986_v28  ;;  %1792 = vmatprep.mubr.msk.bf16.mxu1 %vm579_vm0, %v1988_v29 }
  0x41   :  { %740 = vmatmul.mubr.bf16.gmra.mxu0 %v1990_v30  ;;  %868 = vmatmul.mubr.bf16.gmra.mxu1 %v1991_v31 }
  0x42   :  { %1777 = vmatprep.mubr.msk.bf16.mxu0 %vm579_vm0, %v1992_v32  ;;  %1793 = vmatprep.mubr.msk.bf16.mxu1 %vm579_vm0, %v1994_v33  ;;  %v153_v32 = vld [vmem:[#allocation2 + $0x10] sm:$0xff] }
  0x43   :  { %v185_v33 = vld [vmem:[#allocation2 + $0x110] sm:$0xff] }
  0x49   :  { %748 = vmatmul.mubr.bf16.gmra.mxu0 %v1996_v34  ;;  %876 = vmatmul.mubr.bf16.gmra.mxu1 %v1997_v35  ;;  %v2487_v34 = vld [vmem:[%s2950_s2] ss:$0 sm:$0xff] }
  0x4a   :  { %1778 = vmatprep.mubr.msk.bf16.mxu0 %vm579_vm0, %v1998_v36  ;;  %1794 = vmatprep.mubr.msk.bf16.mxu1 %vm579_vm0, %v2000_v37  ;;  %v2492_v37 = vld [vmem:[%s2951_s3] ss:$0 sm:$0xff] }
  0x51   :  { %756 = vmatmul.mubr.bf16.gmra.mxu0 %v2002_v38  ;;  %884 = vmatmul.mubr.bf16.gmra.mxu1 %v2003_v39 }
  0x52   :  { %1779 = vmatprep.mubr.msk.bf16.mxu0 %vm579_vm0, %v2004_v40  ;;  %1795 = vmatprep.mubr.msk.bf16.mxu1 %vm579_vm0, %v2006_v41  ;;  %v154_v40 = vld [vmem:[#allocation2 + $0x18] sm:$0xff] }
  0x59   :  { %764 = vmatmul.mubr.bf16.gmra.mxu0 %v2008_v42  ;;  %892 = vmatmul.mubr.bf16.gmra.mxu1 %v2009_v43 }
  0x5a   :  { %1780 = vmatprep.mubr.msk.bf16.mxu0 %vm579_vm0, %v2010_v44  ;;  %1796 = vmatprep.mubr.msk.bf16.mxu1 %vm579_vm0, %v2012_v45  ;;  %v186_v45 = vld [vmem:[#allocation2 + $0x118] sm:$0xff] }
  0x61   :  { %772 = vmatmul.mubr.bf16.gmra.mxu0 %v2014_v46  ;;  %900 = vmatmul.mubr.bf16.gmra.mxu1 %v2015_v47 }
  0x62   :  { %1781 = vmatprep.mubr.msk.bf16.mxu0 %vm579_vm0, %v2016_v48  ;;  %1797 = vmatprep.mubr.msk.bf16.mxu1 %vm579_vm0, %v2018_v49 }
  0x69   :  { %780 = vmatmul.mubr.bf16.gmra.mxu0 %v2020_v50  ;;  %908 = vmatmul.mubr.bf16.gmra.mxu1 %v2021_v51 }
  0x6a   :  { %1782 = vmatprep.mubr.msk.bf16.mxu0 %vm579_vm0, %v2022_v52  ;;  %1798 = vmatprep.mubr.msk.bf16.mxu1 %vm579_vm0, %v2024_v53 }
  0x71   :  { %788 = vmatmul.mubr.bf16.gmra.mxu0 %v2026_v54  ;;  %916 = vmatmul.mubr.bf16.gmra.mxu1 %v2027_v55 }
  0x72   :  { %1783 = vmatprep.mubr.msk.bf16.mxu0 %vm579_vm0, %v2028_v56  ;;  %1799 = vmatprep.mubr.msk.bf16.mxu1 %vm579_vm0, %v2030_v57 }
  0x79   :  { %796 = vmatmul.mubr.bf16.gmra.mxu0 %v2032_v58  ;;  %924 = vmatmul.mubr.bf16.gmra.mxu1 %v2033_v59 }
  0x7a   :  { %1784 = vmatprep.mubr.msk.bf16.mxu0 %vm579_vm0, %v2034_v60  ;;  %1800 = vmatprep.mubr.msk.bf16.mxu1 %vm579_vm0, %v2036_v61 }
  0x81   :  { %804 = vmatmul.mubr.bf16.gmra.mxu0 %v2038_v62  ;;  %932 = vmatmul.mubr.bf16.gmra.mxu1 %v2039_v63  ;;  %v155_v62 = vld [vmem:[#allocation2 + $0x20] sm:$0xff] }
  0x82   :  { %1785 = vmatprep.mubr.msk.bf16.mxu0 %vm579_vm0, %v2040_v0  ;;  %1801 = vmatprep.mubr.msk.bf16.mxu1 %vm579_vm0, %v2042_v1  ;;  %v187_v63 = vld [vmem:[#allocation2 + $0x120] sm:$0xff] }
  0x89   :  { %812 = vmatmul.mubr.bf16.gmra.mxu0 %v2044_v2  ;;  %940 = vmatmul.mubr.bf16.gmra.mxu1 %v2045_v3 }
  0x8a   :  { %1786 = vmatprep.mubr.msk.bf16.mxu0 %vm579_vm0, %v2046_v4  ;;  %1802 = vmatprep.mubr.msk.bf16.mxu1 %vm579_vm0, %v2048_v5 }
  0x91   :  { %820 = vmatmul.mubr.bf16.gmra.mxu0 %v2050_v6  ;;  %948 = vmatmul.mubr.bf16.gmra.mxu1 %v2051_v7 }
  0x92   :  { %1787 = vmatprep.mubr.msk.bf16.mxu0 %vm579_vm0, %v2052_v8  ;;  %1803 = vmatprep.mubr.msk.bf16.mxu1 %vm579_vm0, %v2054_v9 }
  0x99   :  { %828 = vmatmul.mubr.bf16.gmra.mxu0 %v2056_v10  ;;  %956 = vmatmul.mubr.bf16.gmra.mxu1 %v2057_v11 }
  0x9a   :  { %1788 = vmatprep.mubr.msk.bf16.mxu0 %vm579_vm0, %v2058_v12  ;;  %1804 = vmatprep.mubr.msk.bf16.mxu1 %vm579_vm0, %v2060_v13 }
  0xa1   :  { %836 = vmatmul.mubr.bf16.gmra.mxu0 %v2062_v14  ;;  %964 = vmatmul.mubr.bf16.gmra.mxu1 %v2063_v15 }
  0xe9   :  { %v717_v18 = vpop.f32.mrf.mxu0  ;;  %v845_v19 = vpop.f32.mrf.mxu1 }
  0xea   :  { %v972_v20 = vadd.f32 %v717_v18, %v151_v16  ;;  %v1004_v21 = vadd.f32 %v845_v19, %v183_v17  ;;  %v156_v16 = vld [vmem:[#allocation2 + $0x28] sm:$0xff] }
  0xeb   :  { %v719_v22 = vpop.f32.mrf.mxu0  ;;  %v847_v23 = vpop.f32.mrf.mxu1  ;;  %v188_v17 = vld [vmem:[#allocation2 + $0x128] sm:$0xff] }
  0xec   :  { %1037 = vst.msk [vmem:[#allocation2] sm:$0xff] %vm22_vm3, %v972_v20  ;;  %1069 = vst.msk [vmem:[#allocation2 + $0x100] sm:$0xff] %vm22_vm3, %v1004_v21 }
  0xed   :  { %v720_v26 = vpop.f32.mrf.mxu0  ;;  %v848_v27 = vpop.f32.mrf.mxu1 }
  0xee   :  { %v973_v28 = vadd.f32 %v720_v26, %v152_v24  ;;  %v1005_v29 = vadd.f32 %v848_v27, %v184_v25 }
  0xef   :  { %v722_v30 = vpop.f32.mrf.mxu0  ;;  %v850_v31 = vpop.f32.mrf.mxu1 }
  0xf0   :  { %1038 = vst.msk [vmem:[#allocation2 + $0x8] sm:$0xff] %vm22_vm3, %v973_v28  ;;  %1070 = vst.msk [vmem:[#allocation2 + $0x108] sm:$0xff] %vm22_vm3, %v1005_v29 }
  0xf1   :  { %v725_v35 = vpop.f32.mrf.mxu0  ;;  %v853_v36 = vpop.f32.mrf.mxu1 }
  0xf2   :  { %v974_v38 = vadd.f32 %v725_v35, %v153_v32  ;;  %v1006_v39 = vadd.f32 %v853_v36, %v185_v33  ;;  %v157_v35 = vld [vmem:[#allocation2 + $0x30] sm:$0xff] }
  0xf3   :  { %v1104_v41 = vld [vmem:[#allocation2] sm:$0xff]  ;;  %v727_v43 = vpop.f32.mrf.mxu0  ;;  %v855_v44 = vpop.f32.mrf.mxu1  ;;  %v189_v36 = vld [vmem:[#allocation2 + $0x130] sm:$0xff] }
  0xf4   :  { %v1136_v42 = vld [vmem:[#allocation2 + $0x100] sm:$0xff]  ;;  %v1175_v46 = vmul.f32 %v2487_v34, %v1104_v41  ;;  %1039 = vst.msk [vmem:[#allocation2 + $0x10] sm:$0xff] %vm22_vm3, %v974_v38  ;;  %1071 = vst.msk [vmem:[#allocation2 + $0x110] sm:$0xff] %vm22_vm3, %v1006_v39 }
  0xf5   :  { %v1207_v47 = vmul.f32 %v2487_v34, %v1136_v42  ;;  %v728_v48 = vpop.f32.mrf.mxu0  ;;  %v856_v49 = vpop.f32.mrf.mxu1 }
  0xf6   :  { %v1246_v50 = vadd.f32 %v2492_v37, %v1175_v46  ;;  %v975_v52 = vadd.f32 %v728_v48, %v154_v40  ;;  %v1007_v53 = vadd.f32 %v856_v49, %v186_v45  ;;  %v158_v48 = vld [vmem:[#allocation2 + $0x38] sm:$0xff] }
  0xf7   :  { %v1278_v51 = vadd.f32 %v2492_v37, %v1207_v47  ;;  %v1105_v54 = vld [vmem:[#allocation2 + $0x8] sm:$0xff]  ;;  %v730_v56 = vpop.f32.mrf.mxu0  ;;  %v858_v57 = vpop.f32.mrf.mxu1  ;;  %v190_v49 = vld [vmem:[#allocation2 + $0x138] sm:$0xff] }
  0xf8   :  { %v1137_v55 = vld [vmem:[#allocation2 + $0x108] sm:$0xff]  ;;  %v1310_v58 = vmax.f32 %v1246_v50, 0.0  ;;  %v1176_v60 = vmul.f32 %v2487_v34, %v1105_v54  ;;  %1040 = vst.msk [vmem:[#allocation2 + $0x18] sm:$0xff] %vm22_vm3, %v975_v52  ;;  %1072 = vst.msk [vmem:[#allocation2 + $0x118] sm:$0xff] %vm22_vm3, %v1007_v53 }
  0xf9   :  { %v1342_v59 = vmax.f32 %v1278_v51, 0.0  ;;  %v1208_v61 = vmul.f32 %v2487_v34, %v1137_v55  ;;  %v733_v0 = vpop.f32.mrf.mxu0  ;;  %v861_v1 = vpop.f32.mrf.mxu1 }
  0xfa   :  { %v1871_v2 = vpack.c.bf16 %v1310_v58, %v1310_v58  ;;  %v1247_v4 = vadd.f32 %v2492_v37, %v1176_v60  ;;  %v976_v8 = vadd.f32 %v733_v0, %v155_v62  ;;  %v1008_v9 = vadd.f32 %v861_v1, %v187_v63 }
  0xfb   :  { %v1903_v3 = vpack.c.bf16 %v1342_v59, %v1342_v59  ;;  %v1279_v5 = vadd.f32 %v2492_v37, %v1208_v61  ;;  %v1106_v6 = vld [vmem:[#allocation2 + $0x10] sm:$0xff]  ;;  %v735_v10 = vpop.f32.mrf.mxu0  ;;  %v863_v11 = vpop.f32.mrf.mxu1 }
  0xfc   :  { %v1138_v7 = vld [vmem:[#allocation2 + $0x110] sm:$0xff]  ;;  %1631 = vst.msk [vmem:[%s2952_s4] sm:$0xf] %vm1630_vm4, %v1871_v2  ;;  %v1311_v12 = vmax.f32 %v1247_v4, 0.0  ;;  %v1177_v14 = vmul.f32 %v2487_v34, %v1106_v6  ;;  %v159_v2 = vld [vmem:[#allocation2 + $0x40] sm:$0xff] }
  0xfd   :  { %1663 = vst.msk [vmem:[%s2952_s4 + $0x80] sm:$0xf] %vm1630_vm4, %v1903_v3  ;;  %v1343_v13 = vmax.f32 %v1279_v5, 0.0  ;;  %v1209_v15 = vmul.f32 %v2487_v34, %v1138_v7  ;;  %v736_v18 = vpop.f32.mrf.mxu0  ;;  %v864_v19 = vpop.f32.mrf.mxu1  ;;  %v191_v3 = vld [vmem:[#allocation2 + $0x140] sm:$0xff] }
  0xfe   :  { %1041 = vst.msk [vmem:[#allocation2 + $0x20] sm:$0xff] %vm22_vm3, %v976_v8  ;;  %1073 = vst.msk [vmem:[#allocation2 + $0x120] sm:$0xff] %vm22_vm3, %v1008_v9  ;;  %v1872_v20 = vpack.c.bf16 %v1311_v12, %v1311_v12  ;;  %v1248_v22 = vadd.f32 %v2492_v37, %v1177_v14  ;;  %v977_v26 = vadd.f32 %v736_v18, %v156_v16 }
  0xff   :  { %v1904_v21 = vpack.c.bf16 %v1343_v13, %v1343_v13  ;;  %v1280_v23 = vadd.f32 %v2492_v37, %v1209_v15  ;;  %v1107_v24 = vld [vmem:[#allocation2 + $0x18] sm:$0xff]  ;;  %v1009_v27 = vadd.f32 %v864_v19, %v188_v17  ;;  %v738_v28 = vpop.f32.mrf.mxu0  ;;  %v866_v29 = vpop.f32.mrf.mxu1 }
 0x100   :  { %v1139_v25 = vld [vmem:[#allocation2 + $0x118] sm:$0xff]  ;;  %1632 = vst.msk [vmem:[%s2952_s4 + $0x4] sm:$0xf] %vm1630_vm4, %v1872_v20  ;;  %v1312_v30 = vmax.f32 %v1248_v22, 0.0  ;;  %v1178_v32 = vmul.f32 %v2487_v34, %v1107_v24  ;;  %v160_v20 = vld [vmem:[#allocation2 + $0x48] sm:$0xff] }
 0x101   :  { %1664 = vst.msk [vmem:[%s2952_s4 + $0x84] sm:$0xf] %vm1630_vm4, %v1904_v21  ;;  %v1344_v31 = vmax.f32 %v1280_v23, 0.0  ;;  %v1210_v33 = vmul.f32 %v2487_v34, %v1139_v25  ;;  %v741_v38 = vpop.f32.mrf.mxu0  ;;  %v869_v39 = vpop.f32.mrf.mxu1  ;;  %v192_v21 = vld [vmem:[#allocation2 + $0x148] sm:$0xff] }
 0x102   :  { %1042 = vst.msk [vmem:[#allocation2 + $0x28] sm:$0xff] %vm22_vm3, %v977_v26  ;;  %1074 = vst.msk [vmem:[#allocation2 + $0x128] sm:$0xff] %vm22_vm3, %v1009_v27  ;;  %v1873_v40 = vpack.c.bf16 %v1312_v30, %v1312_v30  ;;  %v1249_v42 = vadd.f32 %v2492_v37, %v1178_v32  ;;  %v978_v44 = vadd.f32 %v741_v38, %v157_v35  ;;  %v161_v32 = vld [vmem:[#allocation2 + $0x50] sm:$0xff] }
 0x103   :  { %v1905_v41 = vpack.c.bf16 %v1344_v31, %v1344_v31  ;;  %v1281_v43 = vadd.f32 %v2492_v37, %v1210_v33  ;;  %v1010_v45 = vadd.f32 %v869_v39, %v189_v36  ;;  %v743_v46 = vpop.f32.mrf.mxu0  ;;  %v871_v47 = vpop.f32.mrf.mxu1 }
 0x104   :  { %1633 = vst.msk [vmem:[%s2952_s4 + $0x8] sm:$0xf] %vm1630_vm4, %v1873_v40  ;;  %v1313_v50 = vmax.f32 %v1249_v42, 0.0 }
 0x105   :  { %1665 = vst.msk [vmem:[%s2952_s4 + $0x88] sm:$0xf] %vm1630_vm4, %v1905_v41  ;;  %v1345_v51 = vmax.f32 %v1281_v43, 0.0  ;;  %v1108_v52 = vld [vmem:[#allocation2 + $0x20] sm:$0xff]  ;;  %v744_v56 = vpop.f32.mrf.mxu0  ;;  %v872_v57 = vpop.f32.mrf.mxu1  ;;  %v193_v43 = vld [vmem:[#allocation2 + $0x150] sm:$0xff] }
 0x106   :  { %v1140_v53 = vld [vmem:[#allocation2 + $0x120] sm:$0xff]  ;;  %v1179_v54 = vmul.f32 %v2487_v34, %v1108_v52  ;;  %1043 = vst.msk [vmem:[#allocation2 + $0x30] sm:$0xff] %vm22_vm3, %v978_v44  ;;  %1075 = vst.msk [vmem:[#allocation2 + $0x130] sm:$0xff] %vm22_vm3, %v1010_v45  ;;  %v1874_v58 = vpack.c.bf16 %v1313_v50, %v1313_v50  ;;  %v979_v60 = vadd.f32 %v744_v56, %v158_v48 }
 0x107   :  { %v1211_v55 = vmul.f32 %v2487_v34, %v1140_v53  ;;  %v1906_v59 = vpack.c.bf16 %v1345_v51, %v1345_v51  ;;  %v1011_v61 = vadd.f32 %v872_v57, %v190_v49  ;;  %v746_v0 = vpop.f32.mrf.mxu0  ;;  %v874_v1 = vpop.f32.mrf.mxu1 }
 0x108   :  { %v1250_v62 = vadd.f32 %v2492_v37, %v1179_v54  ;;  %1634 = vst.msk [vmem:[%s2952_s4 + $0xc] sm:$0xf] %vm1630_vm4, %v1874_v58  ;;  %v162_v0 = vld [vmem:[#allocation2 + $0x58] sm:$0xff] }
 0x109   :  { %v1282_v63 = vadd.f32 %v2492_v37, %v1211_v55  ;;  %1666 = vst.msk [vmem:[%s2952_s4 + $0x8c] sm:$0xf] %vm1630_vm4, %v1906_v59  ;;  %v1109_v4 = vld [vmem:[#allocation2 + $0x28] sm:$0xff]  ;;  %v749_v10 = vpop.f32.mrf.mxu0  ;;  %v877_v11 = vpop.f32.mrf.mxu1  ;;  %v194_v1 = vld [vmem:[#allocation2 + $0x158] sm:$0xff] }
 0x10a   :  { %v1141_v5 = vld [vmem:[#allocation2 + $0x128] sm:$0xff]  ;;  %1044 = vst.msk [vmem:[#allocation2 + $0x38] sm:$0xff] %vm22_vm3, %v979_v60  ;;  %1076 = vst.msk [vmem:[#allocation2 + $0x138] sm:$0xff] %vm22_vm3, %v1011_v61  ;;  %v1314_v6 = vmax.f32 %v1250_v62, 0.0  ;;  %v1180_v8 = vmul.f32 %v2487_v34, %v1109_v4  ;;  %v980_v12 = vadd.f32 %v749_v10, %v159_v2  ;;  %v1012_v13 = vadd.f32 %v877_v11, %v191_v3 }
 0x10b   :  { %v1346_v7 = vmax.f32 %v1282_v63, 0.0  ;;  %v1212_v9 = vmul.f32 %v2487_v34, %v1141_v5  ;;  %v751_v18 = vpop.f32.mrf.mxu0  ;;  %v879_v19 = vpop.f32.mrf.mxu1 }
 0x10c   :  { %v1875_v14 = vpack.c.bf16 %v1314_v6, %v1314_v6  ;;  %v1251_v16 = vadd.f32 %v2492_v37, %v1180_v8  ;;  %1045 = vst.msk [vmem:[#allocation2 + $0x40] sm:$0xff] %vm22_vm3, %v980_v12  ;;  %1077 = vst.msk [vmem:[#allocation2 + $0x140] sm:$0xff] %vm22_vm3, %v1012_v13  ;;  %v163_v18 = vld [vmem:[#allocation2 + $0x60] sm:$0xff] }
 0x10d   :  { %v1907_v15 = vpack.c.bf16 %v1346_v7, %v1346_v7  ;;  %v1283_v17 = vadd.f32 %v2492_v37, %v1212_v9  ;;  %v1110_v22 = vld [vmem:[#allocation2 + $0x30] sm:$0xff]  ;;  %v752_v28 = vpop.f32.mrf.mxu0  ;;  %v880_v29 = vpop.f32.mrf.mxu1  ;;  %v195_v19 = vld [vmem:[#allocation2 + $0x160] sm:$0xff] }
 0x10e   :  { %v1142_v23 = vld [vmem:[#allocation2 + $0x130] sm:$0xff]  ;;  %1635 = vst.msk [vmem:[%s2952_s4 + $0x10] sm:$0xf] %vm1630_vm4, %v1875_v14  ;;  %v1315_v24 = vmax.f32 %v1251_v16, 0.0  ;;  %v1181_v26 = vmul.f32 %v2487_v34, %v1110_v22  ;;  %v981_v30 = vadd.f32 %v752_v28, %v160_v20  ;;  %v1013_v31 = vadd.f32 %v880_v29, %v192_v21 }
 0x10f   :  { %1667 = vst.msk [vmem:[%s2952_s4 + $0x90] sm:$0xf] %vm1630_vm4, %v1907_v15  ;;  %v1347_v25 = vmax.f32 %v1283_v17, 0.0  ;;  %v1213_v27 = vmul.f32 %v2487_v34, %v1142_v23  ;;  %v754_v41 = vpop.f32.mrf.mxu0  ;;  %v882_v42 = vpop.f32.mrf.mxu1 }
 0x110   :  { %v1876_v33 = vpack.c.bf16 %v1315_v24, %v1315_v24  ;;  %v1252_v36 = vadd.f32 %v2492_v37, %v1181_v26  ;;  %1046 = vst.msk [vmem:[#allocation2 + $0x48] sm:$0xff] %vm22_vm3, %v981_v30  ;;  %1078 = vst.msk [vmem:[#allocation2 + $0x148] sm:$0xff] %vm22_vm3, %v1013_v31 }
 0x111   :  { %v1908_v35 = vpack.c.bf16 %v1347_v25, %v1347_v25  ;;  %v1284_v38 = vadd.f32 %v2492_v37, %v1213_v27  ;;  %v1111_v39 = vld [vmem:[#allocation2 + $0x38] sm:$0xff]  ;;  %v757_v48 = vpop.f32.mrf.mxu0  ;;  %v885_v49 = vpop.f32.mrf.mxu1 }
 0x112   :  { %v1143_v40 = vld [vmem:[#allocation2 + $0x138] sm:$0xff]  ;;  %v1182_v44 = vmul.f32 %v2487_v34, %v1111_v39  ;;  %1636 = vst.msk [vmem:[%s2952_s4 + $0x14] sm:$0xf] %vm1630_vm4, %v1876_v33  ;;  %v1316_v46 = vmax.f32 %v1252_v36, 0.0  ;;  %v982_v52 = vadd.f32 %v757_v48, %v161_v32  ;;  %v1014_v53 = vadd.f32 %v885_v49, %v193_v43  ;;  %v196_v39 = vld [vmem:[#allocation2 + $0x168] sm:$0xff] }
 0x113   :  { %v1214_v45 = vmul.f32 %v2487_v34, %v1143_v40  ;;  %1668 = vst.msk [vmem:[%s2952_s4 + $0x94] sm:$0xf] %vm1630_vm4, %v1908_v35  ;;  %v1348_v47 = vmax.f32 %v1284_v38, 0.0  ;;  %v1112_v56 = vld [vmem:[#allocation2 + $0x40] sm:$0xff]  ;;  %v759_v58 = vpop.f32.mrf.mxu0  ;;  %v887_v59 = vpop.f32.mrf.mxu1  ;;  %v164_v38 = vld [vmem:[#allocation2 + $0x68] sm:$0xff] }
 0x114   :  { %v1253_v50 = vadd.f32 %v2492_v37, %v1182_v44  ;;  %v1877_v54 = vpack.c.bf16 %v1316_v46, %v1316_v46  ;;  %v1144_v57 = vld [vmem:[#allocation2 + $0x140] sm:$0xff]  ;;  %v1183_v62 = vmul.f32 %v2487_v34, %v1112_v56  ;;  %1047 = vst.msk [vmem:[#allocation2 + $0x50] sm:$0xff] %vm22_vm3, %v982_v52  ;;  %1079 = vst.msk [vmem:[#allocation2 + $0x150] sm:$0xff] %vm22_vm3, %v1014_v53 }
 0x115   :  { %v1285_v51 = vadd.f32 %v2492_v37, %v1214_v45  ;;  %v1909_v55 = vpack.c.bf16 %v1348_v47, %v1348_v47  ;;  %v1215_v63 = vmul.f32 %v2487_v34, %v1144_v57  ;;  %v760_v2 = vpop.f32.mrf.mxu0  ;;  %v888_v3 = vpop.f32.mrf.mxu1 }
 0x116   :  { %v1317_v60 = vmax.f32 %v1253_v50, 0.0  ;;  %1637 = vst.msk [vmem:[%s2952_s4 + $0x18] sm:$0xf] %vm1630_vm4, %v1877_v54  ;;  %v1254_v6 = vadd.f32 %v2492_v37, %v1183_v62  ;;  %v983_v10 = vadd.f32 %v760_v2, %v162_v0  ;;  %v1015_v11 = vadd.f32 %v888_v3, %v194_v1  ;;  %v165_v50 = vld [vmem:[#allocation2 + $0x70] sm:$0xff] }
 0x117   :  { %v1349_v61 = vmax.f32 %v1285_v51, 0.0  ;;  %1669 = vst.msk [vmem:[%s2952_s4 + $0x98] sm:$0xf] %vm1630_vm4, %v1909_v55  ;;  %v1286_v7 = vadd.f32 %v2492_v37, %v1215_v63  ;;  %v1113_v8 = vld [vmem:[#allocation2 + $0x48] sm:$0xff]  ;;  %v762_v12 = vpop.f32.mrf.mxu0  ;;  %v890_v13 = vpop.f32.mrf.mxu1  ;;  %v197_v51 = vld [vmem:[#allocation2 + $0x170] sm:$0xff] }
 0x118   :  { %v1878_v4 = vpack.c.bf16 %v1317_v60, %v1317_v60  ;;  %v1145_v9 = vld [vmem:[#allocation2 + $0x148] sm:$0xff]  ;;  %v1318_v14 = vmax.f32 %v1254_v6, 0.0  ;;  %v1184_v16 = vmul.f32 %v2487_v34, %v1113_v8  ;;  %1048 = vst.msk [vmem:[#allocation2 + $0x58] sm:$0xff] %vm22_vm3, %v983_v10  ;;  %1080 = vst.msk [vmem:[#allocation2 + $0x158] sm:$0xff] %vm22_vm3, %v1015_v11 }
 0x119   :  { %v1910_v5 = vpack.c.bf16 %v1349_v61, %v1349_v61  ;;  %v1350_v15 = vmax.f32 %v1286_v7, 0.0  ;;  %v1216_v17 = vmul.f32 %v2487_v34, %v1145_v9  ;;  %v765_v20 = vpop.f32.mrf.mxu0  ;;  %v893_v21 = vpop.f32.mrf.mxu1 }
 0x11a   :  { %1638 = vst.msk [vmem:[%s2952_s4 + $0x1c] sm:$0xf] %vm1630_vm4, %v1878_v4  ;;  %v1879_v22 = vpack.c.bf16 %v1318_v14, %v1318_v14  ;;  %v1255_v24 = vadd.f32 %v2492_v37, %v1184_v16  ;;  %v984_v28 = vadd.f32 %v765_v20, %v163_v18  ;;  %v1016_v29 = vadd.f32 %v893_v21, %v195_v19  ;;  %v166_v4 = vld [vmem:[#allocation2 + $0x78] sm:$0xff] }
 0x11b   :  { %1670 = vst.msk [vmem:[%s2952_s4 + $0x9c] sm:$0xf] %vm1630_vm4, %v1910_v5  ;;  %v1911_v23 = vpack.c.bf16 %v1350_v15, %v1350_v15  ;;  %v1287_v25 = vadd.f32 %v2492_v37, %v1216_v17  ;;  %v1114_v26 = vld [vmem:[#allocation2 + $0x50] sm:$0xff]  ;;  %v767_v30 = vpop.f32.mrf.mxu0  ;;  %v895_v31 = vpop.f32.mrf.mxu1  ;;  %v198_v5 = vld [vmem:[#allocation2 + $0x178] sm:$0xff] }
 0x11c   :  { %v1146_v27 = vld [vmem:[#allocation2 + $0x150] sm:$0xff]  ;;  %1639 = vst.msk [vmem:[%s2952_s4 + $0x20] sm:$0xf] %vm1630_vm4, %v1879_v22  ;;  %v1319_v32 = vmax.f32 %v1255_v24, 0.0  ;;  %v1185_v35 = vmul.f32 %v2487_v34, %v1114_v26  ;;  %v167_v22 = vld [vmem:[#allocation2 + $0x80] sm:$0xff] }
 0x11d   :  { %1671 = vst.msk [vmem:[%s2952_s4 + $0xa0] sm:$0xf] %vm1630_vm4, %v1911_v23  ;;  %v1351_v33 = vmax.f32 %v1287_v25, 0.0  ;;  %v1217_v36 = vmul.f32 %v2487_v34, %v1146_v27  ;;  %v768_v40 = vpop.f32.mrf.mxu0  ;;  %v896_v41 = vpop.f32.mrf.mxu1  ;;  %v199_v23 = vld [vmem:[#allocation2 + $0x180] sm:$0xff] }
 0x11e   :  { %1049 = vst.msk [vmem:[#allocation2 + $0x60] sm:$0xff] %vm22_vm3, %v984_v28  ;;  %1081 = vst.msk [vmem:[#allocation2 + $0x160] sm:$0xff] %vm22_vm3, %v1016_v29  ;;  %v1880_v42 = vpack.c.bf16 %v1319_v32, %v1319_v32  ;;  %v1256_v44 = vadd.f32 %v2492_v37, %v1185_v35  ;;  %v985_v46 = vadd.f32 %v768_v40, %v164_v38  ;;  %v168_v35 = vld [vmem:[#allocation2 + $0x88] sm:$0xff] }
 0x11f   :  { %v1912_v43 = vpack.c.bf16 %v1351_v33, %v1351_v33  ;;  %v1288_v45 = vadd.f32 %v2492_v37, %v1217_v36  ;;  %v1017_v47 = vadd.f32 %v896_v41, %v196_v39  ;;  %v770_v48 = vpop.f32.mrf.mxu0  ;;  %v898_v49 = vpop.f32.mrf.mxu1  ;;  %v1115_v54 = vld [vmem:[#allocation2 + $0x58] sm:$0xff] }
 0x120   :  { %1640 = vst.msk [vmem:[%s2952_s4 + $0x24] sm:$0xf] %vm1630_vm4, %v1880_v42  ;;  %v1320_v52 = vmax.f32 %v1256_v44, 0.0  ;;  %v1147_v55 = vld [vmem:[#allocation2 + $0x158] sm:$0xff]  ;;  %v1186_v56 = vmul.f32 %v2487_v34, %v1115_v54 }
 0x121   :  { %1672 = vst.msk [vmem:[%s2952_s4 + $0xa4] sm:$0xf] %vm1630_vm4, %v1912_v43  ;;  %v1352_v53 = vmax.f32 %v1288_v45, 0.0  ;;  %v1218_v57 = vmul.f32 %v2487_v34, %v1147_v55  ;;  %v773_v58 = vpop.f32.mrf.mxu0  ;;  %v901_v59 = vpop.f32.mrf.mxu1  ;;  %v200_v45 = vld [vmem:[#allocation2 + $0x188] sm:$0xff] }
 0x122   :  { %1050 = vst.msk [vmem:[#allocation2 + $0x68] sm:$0xff] %vm22_vm3, %v985_v46  ;;  %1082 = vst.msk [vmem:[#allocation2 + $0x168] sm:$0xff] %vm22_vm3, %v1017_v47  ;;  %v1881_v60 = vpack.c.bf16 %v1320_v52, %v1320_v52  ;;  %v986_v62 = vadd.f32 %v773_v58, %v165_v50  ;;  %v1018_v63 = vadd.f32 %v901_v59, %v197_v51 }
 0x123   :  { %v1913_v61 = vpack.c.bf16 %v1352_v53, %v1352_v53  ;;  %v1257_v0 = vadd.f32 %v2492_v37, %v1186_v56  ;;  %v1289_v1 = vadd.f32 %v2492_v37, %v1218_v57  ;;  %v775_v2 = vpop.f32.mrf.mxu0  ;;  %v903_v3 = vpop.f32.mrf.mxu1 }
 0x124   :  { %1641 = vst.msk [vmem:[%s2952_s4 + $0x28] sm:$0xf] %vm1630_vm4, %v1881_v60  ;;  %v169_v2 = vld [vmem:[#allocation2 + $0x90] sm:$0xff] }
 0x125   :  { %1673 = vst.msk [vmem:[%s2952_s4 + $0xa8] sm:$0xf] %vm1630_vm4, %v1913_v61  ;;  %v1116_v6 = vld [vmem:[#allocation2 + $0x60] sm:$0xff]  ;;  %v1321_v8 = vmax.f32 %v1257_v0, 0.0  ;;  %v1353_v9 = vmax.f32 %v1289_v1, 0.0  ;;  %v776_v12 = vpop.f32.mrf.mxu0  ;;  %v904_v13 = vpop.f32.mrf.mxu1  ;;  %v201_v3 = vld [vmem:[#allocation2 + $0x190] sm:$0xff] }
 0x126   :  { %v1148_v7 = vld [vmem:[#allocation2 + $0x160] sm:$0xff]  ;;  %1051 = vst.msk [vmem:[#allocation2 + $0x70] sm:$0xff] %vm22_vm3, %v986_v62  ;;  %1083 = vst.msk [vmem:[#allocation2 + $0x170] sm:$0xff] %vm22_vm3, %v1018_v63  ;;  %v1187_v10 = vmul.f32 %v2487_v34, %v1116_v6  ;;  %v987_v14 = vadd.f32 %v776_v12, %v166_v4  ;;  %v1019_v15 = vadd.f32 %v904_v13, %v198_v5 }
 0x127   :  { %v1219_v11 = vmul.f32 %v2487_v34, %v1148_v7  ;;  %v1882_v16 = vpack.c.bf16 %v1321_v8, %v1321_v8  ;;  %v1914_v17 = vpack.c.bf16 %v1353_v9, %v1353_v9  ;;  %v778_v20 = vpop.f32.mrf.mxu0  ;;  %v906_v21 = vpop.f32.mrf.mxu1 }
 0x128   :  { %v1258_v18 = vadd.f32 %v2492_v37, %v1187_v10  ;;  %1052 = vst.msk [vmem:[#allocation2 + $0x78] sm:$0xff] %vm22_vm3, %v987_v14  ;;  %1084 = vst.msk [vmem:[#allocation2 + $0x178] sm:$0xff] %vm22_vm3, %v1019_v15  ;;  %v170_v20 = vld [vmem:[#allocation2 + $0x98] sm:$0xff] }
 0x129   :  { %v1290_v19 = vadd.f32 %v2492_v37, %v1219_v11  ;;  %v1117_v24 = vld [vmem:[#allocation2 + $0x68] sm:$0xff]  ;;  %1642 = vst.msk [vmem:[%s2952_s4 + $0x2c] sm:$0xf] %vm1630_vm4, %v1882_v16  ;;  %1674 = vst.msk [vmem:[%s2952_s4 + $0xac] sm:$0xf] %vm1630_vm4, %v1914_v17  ;;  %v781_v30 = vpop.f32.mrf.mxu0  ;;  %v909_v31 = vpop.f32.mrf.mxu1  ;;  %v202_v21 = vld [vmem:[#allocation2 + $0x198] sm:$0xff] }
 0x12a   :  { %v1149_v25 = vld [vmem:[#allocation2 + $0x168] sm:$0xff]  ;;  %v1322_v26 = vmax.f32 %v1258_v18, 0.0  ;;  %v1188_v28 = vmul.f32 %v2487_v34, %v1117_v24  ;;  %v988_v32 = vadd.f32 %v781_v30, %v167_v22  ;;  %v1020_v33 = vadd.f32 %v909_v31, %v199_v23 }
 0x12b   :  { %v1354_v27 = vmax.f32 %v1290_v19, 0.0  ;;  %v1220_v29 = vmul.f32 %v2487_v34, %v1149_v25  ;;  %v783_v43 = vpop.f32.mrf.mxu0  ;;  %v911_v44 = vpop.f32.mrf.mxu1 }
 0x12c   :  { %v1883_v36 = vpack.c.bf16 %v1322_v26, %v1322_v26  ;;  %v1259_v39 = vadd.f32 %v2492_v37, %v1188_v28  ;;  %1053 = vst.msk [vmem:[#allocation2 + $0x80] sm:$0xff] %vm22_vm3, %v988_v32  ;;  %1085 = vst.msk [vmem:[#allocation2 + $0x180] sm:$0xff] %vm22_vm3, %v1020_v33 }
 0x12d   :  { %v1915_v38 = vpack.c.bf16 %v1354_v27, %v1354_v27  ;;  %v1291_v40 = vadd.f32 %v2492_v37, %v1220_v29  ;;  %v1118_v41 = vld [vmem:[#allocation2 + $0x70] sm:$0xff]  ;;  %v784_v50 = vpop.f32.mrf.mxu0  ;;  %v912_v51 = vpop.f32.mrf.mxu1 }
 0x12e   :  { %v1150_v42 = vld [vmem:[#allocation2 + $0x170] sm:$0xff]  ;;  %v1189_v46 = vmul.f32 %v2487_v34, %v1118_v41  ;;  %1643 = vst.msk [vmem:[%s2952_s4 + $0x30] sm:$0xf] %vm1630_vm4, %v1883_v36  ;;  %v1323_v48 = vmax.f32 %v1259_v39, 0.0  ;;  %v989_v54 = vadd.f32 %v784_v50, %v168_v35  ;;  %v1021_v55 = vadd.f32 %v912_v51, %v200_v45  ;;  %v203_v41 = vld [vmem:[#allocation2 + $0x1a0] sm:$0xff] }
 0x12f   :  { %v1221_v47 = vmul.f32 %v2487_v34, %v1150_v42  ;;  %1675 = vst.msk [vmem:[%s2952_s4 + $0xb0] sm:$0xf] %vm1630_vm4, %v1915_v38  ;;  %v1355_v49 = vmax.f32 %v1291_v40, 0.0  ;;  %v1119_v58 = vld [vmem:[#allocation2 + $0x78] sm:$0xff]  ;;  %v786_v60 = vpop.f32.mrf.mxu0  ;;  %v914_v61 = vpop.f32.mrf.mxu1  ;;  %v171_v40 = vld [vmem:[#allocation2 + $0xa0] sm:$0xff] }
 0x130   :  { %v1260_v52 = vadd.f32 %v2492_v37, %v1189_v46  ;;  %v1884_v56 = vpack.c.bf16 %v1323_v48, %v1323_v48  ;;  %v1151_v59 = vld [vmem:[#allocation2 + $0x178] sm:$0xff]  ;;  %v1190_v0 = vmul.f32 %v2487_v34, %v1119_v58  ;;  %1054 = vst.msk [vmem:[#allocation2 + $0x88] sm:$0xff] %vm22_vm3, %v989_v54  ;;  %1086 = vst.msk [vmem:[#allocation2 + $0x188] sm:$0xff] %vm22_vm3, %v1021_v55 }
 0x131   :  { %v1292_v53 = vadd.f32 %v2492_v37, %v1221_v47  ;;  %v1916_v57 = vpack.c.bf16 %v1355_v49, %v1355_v49  ;;  %v1222_v1 = vmul.f32 %v2487_v34, %v1151_v59  ;;  %v789_v4 = vpop.f32.mrf.mxu0  ;;  %v917_v5 = vpop.f32.mrf.mxu1 }
 0x132   :  { %v1324_v62 = vmax.f32 %v1260_v52, 0.0  ;;  %1644 = vst.msk [vmem:[%s2952_s4 + $0x34] sm:$0xf] %vm1630_vm4, %v1884_v56  ;;  %v1261_v8 = vadd.f32 %v2492_v37, %v1190_v0  ;;  %v990_v12 = vadd.f32 %v789_v4, %v169_v2  ;;  %v1022_v13 = vadd.f32 %v917_v5, %v201_v3  ;;  %v172_v52 = vld [vmem:[#allocation2 + $0xa8] sm:$0xff] }
 0x133   :  { %v1356_v63 = vmax.f32 %v1292_v53, 0.0  ;;  %1676 = vst.msk [vmem:[%s2952_s4 + $0xb4] sm:$0xf] %vm1630_vm4, %v1916_v57  ;;  %v1293_v9 = vadd.f32 %v2492_v37, %v1222_v1  ;;  %v1120_v10 = vld [vmem:[#allocation2 + $0x80] sm:$0xff]  ;;  %v791_v14 = vpop.f32.mrf.mxu0  ;;  %v919_v15 = vpop.f32.mrf.mxu1  ;;  %v204_v53 = vld [vmem:[#allocation2 + $0x1a8] sm:$0xff] }
 0x134   :  { %v1885_v6 = vpack.c.bf16 %v1324_v62, %v1324_v62  ;;  %v1152_v11 = vld [vmem:[#allocation2 + $0x180] sm:$0xff]  ;;  %v1325_v16 = vmax.f32 %v1261_v8, 0.0  ;;  %v1191_v18 = vmul.f32 %v2487_v34, %v1120_v10  ;;  %1055 = vst.msk [vmem:[#allocation2 + $0x90] sm:$0xff] %vm22_vm3, %v990_v12  ;;  %1087 = vst.msk [vmem:[#allocation2 + $0x190] sm:$0xff] %vm22_vm3, %v1022_v13 }
 0x135   :  { %v1917_v7 = vpack.c.bf16 %v1356_v63, %v1356_v63  ;;  %v1357_v17 = vmax.f32 %v1293_v9, 0.0  ;;  %v1223_v19 = vmul.f32 %v2487_v34, %v1152_v11  ;;  %v792_v22 = vpop.f32.mrf.mxu0  ;;  %v920_v23 = vpop.f32.mrf.mxu1 }
 0x136   :  { %1645 = vst.msk [vmem:[%s2952_s4 + $0x38] sm:$0xf] %vm1630_vm4, %v1885_v6  ;;  %v1886_v24 = vpack.c.bf16 %v1325_v16, %v1325_v16  ;;  %v1262_v26 = vadd.f32 %v2492_v37, %v1191_v18  ;;  %v991_v30 = vadd.f32 %v792_v22, %v170_v20  ;;  %v1023_v31 = vadd.f32 %v920_v23, %v202_v21  ;;  %v173_v6 = vld [vmem:[#allocation2 + $0xb0] sm:$0xff] }
 0x137   :  { %1677 = vst.msk [vmem:[%s2952_s4 + $0xb8] sm:$0xf] %vm1630_vm4, %v1917_v7  ;;  %v1918_v25 = vpack.c.bf16 %v1357_v17, %v1357_v17  ;;  %v1294_v27 = vadd.f32 %v2492_v37, %v1223_v19  ;;  %v1121_v28 = vld [vmem:[#allocation2 + $0x88] sm:$0xff]  ;;  %v794_v32 = vpop.f32.mrf.mxu0  ;;  %v922_v33 = vpop.f32.mrf.mxu1  ;;  %v205_v7 = vld [vmem:[#allocation2 + $0x1b0] sm:$0xff] }
 0x138   :  { %v1153_v29 = vld [vmem:[#allocation2 + $0x188] sm:$0xff]  ;;  %1646 = vst.msk [vmem:[%s2952_s4 + $0x3c] sm:$0xf] %vm1630_vm4, %v1886_v24  ;;  %v1326_v35 = vmax.f32 %v1262_v26, 0.0  ;;  %v1192_v38 = vmul.f32 %v2487_v34, %v1121_v28  ;;  %v174_v24 = vld [vmem:[#allocation2 + $0xb8] sm:$0xff] }
 0x139   :  { %1678 = vst.msk [vmem:[%s2952_s4 + $0xbc] sm:$0xf] %vm1630_vm4, %v1918_v25  ;;  %v1358_v36 = vmax.f32 %v1294_v27, 0.0  ;;  %v1224_v39 = vmul.f32 %v2487_v34, %v1153_v29  ;;  %v797_v42 = vpop.f32.mrf.mxu0  ;;  %v925_v43 = vpop.f32.mrf.mxu1  ;;  %v206_v25 = vld [vmem:[#allocation2 + $0x1b8] sm:$0xff] }
 0x13a   :  { %1056 = vst.msk [vmem:[#allocation2 + $0x98] sm:$0xff] %vm22_vm3, %v991_v30  ;;  %1088 = vst.msk [vmem:[#allocation2 + $0x198] sm:$0xff] %vm22_vm3, %v1023_v31  ;;  %v1887_v44 = vpack.c.bf16 %v1326_v35, %v1326_v35  ;;  %v1263_v46 = vadd.f32 %v2492_v37, %v1192_v38  ;;  %v992_v48 = vadd.f32 %v797_v42, %v171_v40  ;;  %v175_v38 = vld [vmem:[#allocation2 + $0xc0] sm:$0xff] }
 0x13b   :  { %v1919_v45 = vpack.c.bf16 %v1358_v36, %v1358_v36  ;;  %v1295_v47 = vadd.f32 %v2492_v37, %v1224_v39  ;;  %v1024_v49 = vadd.f32 %v925_v43, %v203_v41  ;;  %v799_v50 = vpop.f32.mrf.mxu0  ;;  %v927_v51 = vpop.f32.mrf.mxu1  ;;  %v1122_v56 = vld [vmem:[#allocation2 + $0x90] sm:$0xff] }
 0x13c   :  { %1647 = vst.msk [vmem:[%s2952_s4 + $0x40] sm:$0xf] %vm1630_vm4, %v1887_v44  ;;  %v1327_v54 = vmax.f32 %v1263_v46, 0.0  ;;  %v1154_v57 = vld [vmem:[#allocation2 + $0x190] sm:$0xff]  ;;  %v1193_v58 = vmul.f32 %v2487_v34, %v1122_v56 }
 0x13d   :  { %1679 = vst.msk [vmem:[%s2952_s4 + $0xc0] sm:$0xf] %vm1630_vm4, %v1919_v45  ;;  %v1359_v55 = vmax.f32 %v1295_v47, 0.0  ;;  %v1225_v59 = vmul.f32 %v2487_v34, %v1154_v57  ;;  %v800_v60 = vpop.f32.mrf.mxu0  ;;  %v928_v61 = vpop.f32.mrf.mxu1  ;;  %v207_v47 = vld [vmem:[#allocation2 + $0x1c0] sm:$0xff] }
 0x13e   :  { %1057 = vst.msk [vmem:[#allocation2 + $0xa0] sm:$0xff] %vm22_vm3, %v992_v48  ;;  %1089 = vst.msk [vmem:[#allocation2 + $0x1a0] sm:$0xff] %vm22_vm3, %v1024_v49  ;;  %v1888_v62 = vpack.c.bf16 %v1327_v54, %v1327_v54  ;;  %v993_v0 = vadd.f32 %v800_v60, %v172_v52  ;;  %v1025_v1 = vadd.f32 %v928_v61, %v204_v53 }
 0x13f   :  { %v1920_v63 = vpack.c.bf16 %v1359_v55, %v1359_v55  ;;  %v1264_v2 = vadd.f32 %v2492_v37, %v1193_v58  ;;  %v1296_v3 = vadd.f32 %v2492_v37, %v1225_v59  ;;  %v802_v4 = vpop.f32.mrf.mxu0  ;;  %v930_v5 = vpop.f32.mrf.mxu1 }
 0x140   :  { %1648 = vst.msk [vmem:[%s2952_s4 + $0x44] sm:$0xf] %vm1630_vm4, %v1888_v62  ;;  %v176_v4 = vld [vmem:[#allocation2 + $0xc8] sm:$0xff] }
 0x141   :  { %1680 = vst.msk [vmem:[%s2952_s4 + $0xc4] sm:$0xf] %vm1630_vm4, %v1920_v63  ;;  %v1123_v8 = vld [vmem:[#allocation2 + $0x98] sm:$0xff]  ;;  %v1328_v10 = vmax.f32 %v1264_v2, 0.0  ;;  %v1360_v11 = vmax.f32 %v1296_v3, 0.0  ;;  %v805_v14 = vpop.f32.mrf.mxu0  ;;  %v933_v15 = vpop.f32.mrf.mxu1  ;;  %v208_v5 = vld [vmem:[#allocation2 + $0x1c8] sm:$0xff] }
 0x142   :  { %v1155_v9 = vld [vmem:[#allocation2 + $0x198] sm:$0xff]  ;;  %1058 = vst.msk [vmem:[#allocation2 + $0xa8] sm:$0xff] %vm22_vm3, %v993_v0  ;;  %1090 = vst.msk [vmem:[#allocation2 + $0x1a8] sm:$0xff] %vm22_vm3, %v1025_v1  ;;  %v1194_v12 = vmul.f32 %v2487_v34, %v1123_v8  ;;  %v994_v16 = vadd.f32 %v805_v14, %v173_v6  ;;  %v1026_v17 = vadd.f32 %v933_v15, %v205_v7 }
 0x143   :  { %v1226_v13 = vmul.f32 %v2487_v34, %v1155_v9  ;;  %v1889_v18 = vpack.c.bf16 %v1328_v10, %v1328_v10  ;;  %v1921_v19 = vpack.c.bf16 %v1360_v11, %v1360_v11  ;;  %v807_v22 = vpop.f32.mrf.mxu0  ;;  %v935_v23 = vpop.f32.mrf.mxu1 }
 0x144   :  { %v1265_v20 = vadd.f32 %v2492_v37, %v1194_v12  ;;  %1059 = vst.msk [vmem:[#allocation2 + $0xb0] sm:$0xff] %vm22_vm3, %v994_v16  ;;  %1091 = vst.msk [vmem:[#allocation2 + $0x1b0] sm:$0xff] %vm22_vm3, %v1026_v17  ;;  %v209_v22 = vld [vmem:[#allocation2 + $0x1d0] sm:$0xff] }
 0x145   :  { %v1297_v21 = vadd.f32 %v2492_v37, %v1226_v13  ;;  %v1124_v26 = vld [vmem:[#allocation2 + $0xa0] sm:$0xff]  ;;  %1649 = vst.msk [vmem:[%s2952_s4 + $0x48] sm:$0xf] %vm1630_vm4, %v1889_v18  ;;  %1681 = vst.msk [vmem:[%s2952_s4 + $0xc8] sm:$0xf] %vm1630_vm4, %v1921_v19  ;;  %v808_v32 = vpop.f32.mrf.mxu0  ;;  %v936_v33 = vpop.f32.mrf.mxu1 }
 0x146   :  { %v1156_v27 = vld [vmem:[#allocation2 + $0x1a0] sm:$0xff]  ;;  %v1329_v28 = vmax.f32 %v1265_v20, 0.0  ;;  %v1195_v30 = vmul.f32 %v2487_v34, %v1124_v26  ;;  %v995_v35 = vadd.f32 %v808_v32, %v174_v24  ;;  %v1027_v36 = vadd.f32 %v936_v33, %v206_v25 }
 0x147   :  { %v1361_v29 = vmax.f32 %v1297_v21, 0.0  ;;  %v1227_v31 = vmul.f32 %v2487_v34, %v1156_v27  ;;  %v810_v45 = vpop.f32.mrf.mxu0  ;;  %v938_v46 = vpop.f32.mrf.mxu1  ;;  %v177_v21 = vld [vmem:[#allocation2 + $0xd0] sm:$0xff]  ;;  %v2820_v27 = vld [vmem:[%s2951_s3] ss:$0 sm:$0xff] }
 0x148   :  { %v1890_v39 = vpack.c.bf16 %v1329_v28, %v1329_v28  ;;  %v1266_v41 = vadd.f32 %v2492_v37, %v1195_v30  ;;  %1060 = vst.msk [vmem:[#allocation2 + $0xb8] sm:$0xff] %vm22_vm3, %v995_v35  ;;  %1092 = vst.msk [vmem:[#allocation2 + $0x1b8] sm:$0xff] %vm22_vm3, %v1027_v36 }
 0x149   :  { %v1922_v40 = vpack.c.bf16 %v1361_v29, %v1361_v29  ;;  %v1298_v42 = vadd.f32 %v2492_v37, %v1227_v31  ;;  %v1125_v43 = vld [vmem:[#allocation2 + $0xa8] sm:$0xff]  ;;  %v813_v52 = vpop.f32.mrf.mxu0  ;;  %v941_v53 = vpop.f32.mrf.mxu1 }
 0x14a   :  { %v1157_v44 = vld [vmem:[#allocation2 + $0x1a8] sm:$0xff]  ;;  %v1196_v48 = vmul.f32 %v2487_v34, %v1125_v43  ;;  %1650 = vst.msk [vmem:[%s2952_s4 + $0x4c] sm:$0xf] %vm1630_vm4, %v1890_v39  ;;  %v1330_v50 = vmax.f32 %v1266_v41, 0.0  ;;  %v996_v56 = vadd.f32 %v813_v52, %v175_v38  ;;  %v1028_v57 = vadd.f32 %v941_v53, %v207_v47  ;;  %v210_v43 = vld [vmem:[#allocation2 + $0x1d8] sm:$0xff] }
 0x14b   :  { %v1228_v49 = vmul.f32 %v2487_v34, %v1157_v44  ;;  %1682 = vst.msk [vmem:[%s2952_s4 + $0xcc] sm:$0xf] %vm1630_vm4, %v1922_v40  ;;  %v1362_v51 = vmax.f32 %v1298_v42, 0.0  ;;  %v1126_v60 = vld [vmem:[#allocation2 + $0xb0] sm:$0xff]  ;;  %v815_v62 = vpop.f32.mrf.mxu0  ;;  %v943_v63 = vpop.f32.mrf.mxu1  ;;  %v178_v42 = vld [vmem:[#allocation2 + $0xd8] sm:$0xff] }
 0x14c   :  { %v1267_v54 = vadd.f32 %v2492_v37, %v1196_v48  ;;  %v1891_v58 = vpack.c.bf16 %v1330_v50, %v1330_v50  ;;  %v1158_v61 = vld [vmem:[#allocation2 + $0x1b0] sm:$0xff]  ;;  %v1197_v2 = vmul.f32 %v2487_v34, %v1126_v60  ;;  %1061 = vst.msk [vmem:[#allocation2 + $0xc0] sm:$0xff] %vm22_vm3, %v996_v56  ;;  %1093 = vst.msk [vmem:[#allocation2 + $0x1c0] sm:$0xff] %vm22_vm3, %v1028_v57 }
 0x14d   :  { %v1299_v55 = vadd.f32 %v2492_v37, %v1228_v49  ;;  %v1923_v59 = vpack.c.bf16 %v1362_v51, %v1362_v51  ;;  %v1229_v3 = vmul.f32 %v2487_v34, %v1158_v61  ;;  %v816_v6 = vpop.f32.mrf.mxu0  ;;  %v944_v7 = vpop.f32.mrf.mxu1 }
 0x14e   :  { %v1331_v0 = vmax.f32 %v1267_v54, 0.0  ;;  %1651 = vst.msk [vmem:[%s2952_s4 + $0x50] sm:$0xf] %vm1630_vm4, %v1891_v58  ;;  %v1268_v9 = vadd.f32 %v2492_v37, %v1197_v2  ;;  %v997_v13 = vadd.f32 %v816_v6, %v176_v4  ;;  %v1029_v14 = vadd.f32 %v944_v7, %v208_v5  ;;  %v179_v54 = vld [vmem:[#allocation2 + $0xe0] sm:$0xff] }
 0x14f   :  { %v1363_v1 = vmax.f32 %v1299_v55, 0.0  ;;  %1683 = vst.msk [vmem:[%s2952_s4 + $0xd0] sm:$0xf] %vm1630_vm4, %v1923_v59  ;;  %v1300_v10 = vadd.f32 %v2492_v37, %v1229_v3  ;;  %v1127_v11 = vld [vmem:[#allocation2 + $0xb8] sm:$0xff]  ;;  %v818_v15 = vpop.f32.mrf.mxu0  ;;  %v946_v16 = vpop.f32.mrf.mxu1  ;;  %v2811_v37 = vld [vmem:[%s2950_s2] ss:$0 sm:$0xff] }
 0x150   :  { %v1892_v8 = vpack.c.bf16 %v1331_v0, %v1331_v0  ;;  %v1159_v12 = vld [vmem:[#allocation2 + $0x1b8] sm:$0xff]  ;;  %v1332_v17 = vmax.f32 %v1268_v9, 0.0  ;;  %v1198_v19 = vmul.f32 %v2811_v37, %v1127_v11  ;;  %1062 = vst.msk [vmem:[#allocation2 + $0xc8] sm:$0xff] %vm22_vm3, %v997_v13  ;;  %1094 = vst.msk [vmem:[#allocation2 + $0x1c8] sm:$0xff] %vm22_vm3, %v1029_v14  ;;  %v211_v55 = vld [vmem:[#allocation2 + $0x1e0] sm:$0xff] }
 0x151   :  { %v1924_v34 = vpack.c.bf16 %v1363_v1, %v1363_v1  ;;  %v1364_v18 = vmax.f32 %v1300_v10, 0.0  ;;  %v1230_v20 = vmul.f32 %v2811_v37, %v1159_v12  ;;  %v821_v23 = vpop.f32.mrf.mxu0  ;;  %v949_v24 = vpop.f32.mrf.mxu1 }
 0x152   :  { %1652 = vst.msk [vmem:[%s2952_s4 + $0x54] sm:$0xf] %vm1630_vm4, %v1892_v8  ;;  %v1893_v25 = vpack.c.bf16 %v1332_v17, %v1332_v17  ;;  %v1269_v28 = vadd.f32 %v2820_v27, %v1198_v19  ;;  %v998_v32 = vadd.f32 %v821_v23, %v177_v21  ;;  %v1030_v33 = vadd.f32 %v949_v24, %v209_v22  ;;  %v180_v8 = vld [vmem:[#allocation2 + $0xe8] sm:$0xff] }
 0x153   :  { %1684 = vst.msk [vmem:[%s2952_s4 + $0xd4] sm:$0xf] %vm1630_vm4, %v1924_v34  ;;  %v1925_v26 = vpack.c.bf16 %v1364_v18, %v1364_v18  ;;  %v1301_v29 = vadd.f32 %v2820_v27, %v1230_v20  ;;  %v1128_v30 = vld [vmem:[#allocation2 + $0xc0] sm:$0xff]  ;;  %v823_v35 = vpop.f32.mrf.mxu0  ;;  %v951_v36 = vpop.f32.mrf.mxu1  ;;  %v212_v34 = vld [vmem:[#allocation2 + $0x1e8] sm:$0xff] }
 0x154   :  { %v1160_v31 = vld [vmem:[#allocation2 + $0x1c0] sm:$0xff]  ;;  %1653 = vst.msk [vmem:[%s2952_s4 + $0x58] sm:$0xf] %vm1630_vm4, %v1893_v25  ;;  %v1333_v38 = vmax.f32 %v1269_v28, 0.0  ;;  %v1199_v40 = vmul.f32 %v2811_v37, %v1128_v30  ;;  %v181_v25 = vld [vmem:[#allocation2 + $0xf0] sm:$0xff] }
 0x155   :  { %1685 = vst.msk [vmem:[%s2952_s4 + $0xd8] sm:$0xf] %vm1630_vm4, %v1925_v26  ;;  %v1365_v39 = vmax.f32 %v1301_v29, 0.0  ;;  %v1231_v41 = vmul.f32 %v2811_v37, %v1160_v31  ;;  %v824_v44 = vpop.f32.mrf.mxu0  ;;  %v952_v45 = vpop.f32.mrf.mxu1  ;;  %v213_v26 = vld [vmem:[#allocation2 + $0x1f0] sm:$0xff] }
 0x156   :  { %1063 = vst.msk [vmem:[#allocation2 + $0xd0] sm:$0xff] %vm22_vm3, %v998_v32  ;;  %1095 = vst.msk [vmem:[#allocation2 + $0x1d0] sm:$0xff] %vm22_vm3, %v1030_v33  ;;  %v1894_v46 = vpack.c.bf16 %v1333_v38, %v1333_v38  ;;  %v1270_v48 = vadd.f32 %v2820_v27, %v1199_v40  ;;  %v999_v50 = vadd.f32 %v824_v44, %v178_v42  ;;  %v182_v40 = vld [vmem:[#allocation2 + $0xf8] sm:$0xff] }
 0x157   :  { %v1926_v47 = vpack.c.bf16 %v1365_v39, %v1365_v39  ;;  %v1302_v49 = vadd.f32 %v2820_v27, %v1231_v41  ;;  %v1031_v51 = vadd.f32 %v952_v45, %v210_v43  ;;  %v826_v52 = vpop.f32.mrf.mxu0  ;;  %v954_v53 = vpop.f32.mrf.mxu1  ;;  %v1129_v58 = vld [vmem:[#allocation2 + $0xc8] sm:$0xff] }
 0x158   :  { %1654 = vst.msk [vmem:[%s2952_s4 + $0x5c] sm:$0xf] %vm1630_vm4, %v1894_v46  ;;  %v1334_v56 = vmax.f32 %v1270_v48, 0.0  ;;  %v1161_v59 = vld [vmem:[#allocation2 + $0x1c8] sm:$0xff]  ;;  %v1200_v60 = vmul.f32 %v2811_v37, %v1129_v58 }
 0x159   :  { %1686 = vst.msk [vmem:[%s2952_s4 + $0xdc] sm:$0xf] %vm1630_vm4, %v1926_v47  ;;  %v1366_v57 = vmax.f32 %v1302_v49, 0.0  ;;  %v1232_v61 = vmul.f32 %v2811_v37, %v1161_v59  ;;  %v829_v62 = vpop.f32.mrf.mxu0  ;;  %v957_v63 = vpop.f32.mrf.mxu1  ;;  %v214_v49 = vld [vmem:[#allocation2 + $0x1f8] sm:$0xff] }
 0x15a   :  { %1064 = vst.msk [vmem:[#allocation2 + $0xd8] sm:$0xff] %vm22_vm3, %v999_v50  ;;  %1096 = vst.msk [vmem:[#allocation2 + $0x1d8] sm:$0xff] %vm22_vm3, %v1031_v51  ;;  %v1895_v0 = vpack.c.bf16 %v1334_v56, %v1334_v56  ;;  %v1000_v2 = vadd.f32 %v829_v62, %v179_v54  ;;  %v1032_v3 = vadd.f32 %v957_v63, %v211_v55 }
 0x15b   :  { %v1927_v1 = vpack.c.bf16 %v1366_v57, %v1366_v57  ;;  %v1271_v4 = vadd.f32 %v2820_v27, %v1200_v60  ;;  %v1303_v5 = vadd.f32 %v2820_v27, %v1232_v61  ;;  %v831_v6 = vpop.f32.mrf.mxu0  ;;  %v959_v7 = vpop.f32.mrf.mxu1 }
 0x15c   :  { %1655 = vst.msk [vmem:[%s2952_s4 + $0x60] sm:$0xf] %vm1630_vm4, %v1895_v0 }
 0x15d   :  { %1687 = vst.msk [vmem:[%s2952_s4 + $0xe0] sm:$0xf] %vm1630_vm4, %v1927_v1  ;;  %v1130_v9 = vld [vmem:[#allocation2 + $0xd0] sm:$0xff]  ;;  %v1335_v11 = vmax.f32 %v1271_v4, 0.0  ;;  %v1367_v12 = vmax.f32 %v1303_v5, 0.0  ;;  %v832_v15 = vpop.f32.mrf.mxu0  ;;  %v960_v16 = vpop.f32.mrf.mxu1 }
 0x15e   :  { %v1162_v10 = vld [vmem:[#allocation2 + $0x1d0] sm:$0xff]  ;;  %1065 = vst.msk [vmem:[#allocation2 + $0xe0] sm:$0xff] %vm22_vm3, %v1000_v2  ;;  %1097 = vst.msk [vmem:[#allocation2 + $0x1e0] sm:$0xff] %vm22_vm3, %v1032_v3  ;;  %v1201_v13 = vmul.f32 %v2811_v37, %v1130_v9  ;;  %v1001_v17 = vadd.f32 %v832_v15, %v180_v8  ;;  %v1033_v18 = vadd.f32 %v960_v16, %v212_v34 }
 0x15f   :  { %v1233_v14 = vmul.f32 %v2811_v37, %v1162_v10  ;;  %v1896_v19 = vpack.c.bf16 %v1335_v11, %v1335_v11  ;;  %v1928_v20 = vpack.c.bf16 %v1367_v12, %v1367_v12  ;;  %v834_v23 = vpop.f32.mrf.mxu0  ;;  %v962_v24 = vpop.f32.mrf.mxu1 }
 0x160   :  { %v1272_v21 = vadd.f32 %v2820_v27, %v1201_v13  ;;  %1066 = vst.msk [vmem:[#allocation2 + $0xe8] sm:$0xff] %vm22_vm3, %v1001_v17  ;;  %1098 = vst.msk [vmem:[#allocation2 + $0x1e8] sm:$0xff] %vm22_vm3, %v1033_v18 }
 0x161   :  { %v1304_v22 = vadd.f32 %v2820_v27, %v1233_v14  ;;  %v1131_v28 = vld [vmem:[#allocation2 + $0xd8] sm:$0xff]  ;;  %1656 = vst.msk [vmem:[%s2952_s4 + $0x64] sm:$0xf] %vm1630_vm4, %v1896_v19  ;;  %1688 = vst.msk [vmem:[%s2952_s4 + $0xe4] sm:$0xf] %vm1630_vm4, %v1928_v20  ;;  %v837_v35 = vpop.f32.mrf.mxu0  ;;  %v965_v36 = vpop.f32.mrf.mxu1 }
 0x162   :  { %v1163_v29 = vld [vmem:[#allocation2 + $0x1d8] sm:$0xff]  ;;  %v1336_v30 = vmax.f32 %v1272_v21, 0.0  ;;  %v1202_v32 = vmul.f32 %v2811_v37, %v1131_v28  ;;  %v1002_v38 = vadd.f32 %v837_v35, %v181_v25  ;;  %v1034_v39 = vadd.f32 %v965_v36, %v213_v26 }
 0x163   :  { %v1368_v31 = vmax.f32 %v1304_v22, 0.0  ;;  %v1234_v33 = vmul.f32 %v2811_v37, %v1163_v29  ;;  %v839_v47 = vpop.f32.mrf.mxu0  ;;  %v967_v48 = vpop.f32.mrf.mxu1 }
 0x164   :  { %v1897_v41 = vpack.c.bf16 %v1336_v30, %v1336_v30  ;;  %v1273_v43 = vadd.f32 %v2820_v27, %v1202_v32  ;;  %1067 = vst.msk [vmem:[#allocation2 + $0xf0] sm:$0xff] %vm22_vm3, %v1002_v38  ;;  %1099 = vst.msk [vmem:[#allocation2 + $0x1f0] sm:$0xff] %vm22_vm3, %v1034_v39 }
 0x165   :  { %v1929_v42 = vpack.c.bf16 %v1368_v31, %v1368_v31  ;;  %v1305_v44 = vadd.f32 %v2820_v27, %v1234_v33  ;;  %v1132_v45 = vld [vmem:[#allocation2 + $0xe0] sm:$0xff]  ;;  %v840_v54 = vpop.f32.mrf.mxu0  ;;  %v968_v55 = vpop.f32.mrf.mxu1 }
 0x166   :  { %v1164_v46 = vld [vmem:[#allocation2 + $0x1e0] sm:$0xff]  ;;  %v1203_v50 = vmul.f32 %v2811_v37, %v1132_v45  ;;  %1657 = vst.msk [vmem:[%s2952_s4 + $0x68] sm:$0xf] %vm1630_vm4, %v1897_v41  ;;  %v1337_v52 = vmax.f32 %v1273_v43, 0.0  ;;  %v1003_v58 = vadd.f32 %v840_v54, %v182_v40  ;;  %v1035_v59 = vadd.f32 %v968_v55, %v214_v49 }
 0x167   :  { %v1235_v51 = vmul.f32 %v2811_v37, %v1164_v46  ;;  %1689 = vst.msk [vmem:[%s2952_s4 + $0xe8] sm:$0xf] %vm1630_vm4, %v1929_v42  ;;  %v1369_v53 = vmax.f32 %v1305_v44, 0.0  ;;  %v1133_v62 = vld [vmem:[#allocation2 + $0xe8] sm:$0xff]  ;;  %v842_v0 = vpop.f32.mrf.mxu0  ;;  %v970_v1 = vpop.f32.mrf.mxu1 }
 0x168   :  { %v1274_v56 = vadd.f32 %v2820_v27, %v1203_v50  ;;  %v1898_v60 = vpack.c.bf16 %v1337_v52, %v1337_v52  ;;  %v1165_v63 = vld [vmem:[#allocation2 + $0x1e8] sm:$0xff]  ;;  %v1204_v4 = vmul.f32 %v2811_v37, %v1133_v62  ;;  %1068 = vst.msk [vmem:[#allocation2 + $0xf8] sm:$0xff] %vm22_vm3, %v1003_v58  ;;  %1100 = vst.msk [vmem:[#allocation2 + $0x1f8] sm:$0xff] %vm22_vm3, %v1035_v59 }
 0x169   :  { %v1306_v57 = vadd.f32 %v2820_v27, %v1235_v51  ;;  %v1930_v61 = vpack.c.bf16 %v1369_v53, %v1369_v53  ;;  %v1236_v5 = vmul.f32 %v2811_v37, %v1165_v63 }
 0x16a   :  { %v1338_v2 = vmax.f32 %v1274_v56, 0.0  ;;  %1658 = vst.msk [vmem:[%s2952_s4 + $0x6c] sm:$0xf] %vm1630_vm4, %v1898_v60  ;;  %v1275_v8 = vadd.f32 %v2820_v27, %v1204_v4 }
 0x16b   :  { %v1370_v3 = vmax.f32 %v1306_v57, 0.0  ;;  %1690 = vst.msk [vmem:[%s2952_s4 + $0xec] sm:$0xf] %vm1630_vm4, %v1930_v61  ;;  %v1307_v34 = vadd.f32 %v2820_v27, %v1236_v5  ;;  %v1134_v9 = vld [vmem:[#allocation2 + $0xf0] sm:$0xff] }
 0x16c   :  { %v1899_v6 = vpack.c.bf16 %v1338_v2, %v1338_v2  ;;  %v1166_v10 = vld [vmem:[#allocation2 + $0x1f0] sm:$0xff]  ;;  %v1339_v11 = vmax.f32 %v1275_v8, 0.0  ;;  %v1205_v13 = vmul.f32 %v2811_v37, %v1134_v9 }
 0x16d   :  { %v1931_v7 = vpack.c.bf16 %v1370_v3, %v1370_v3  ;;  %v1371_v12 = vmax.f32 %v1307_v34, 0.0  ;;  %v1237_v14 = vmul.f32 %v2811_v37, %v1166_v10 }
 0x16e   :  { %1659 = vst.msk [vmem:[%s2952_s4 + $0x70] sm:$0xf] %vm1630_vm4, %v1899_v6  ;;  %v1900_v15 = vpack.c.bf16 %v1339_v11, %v1339_v11  ;;  %v1276_v17 = vadd.f32 %v2820_v27, %v1205_v13 }
 0x16f   :  { %1691 = vst.msk [vmem:[%s2952_s4 + $0xf0] sm:$0xf] %vm1630_vm4, %v1931_v7  ;;  %v1932_v16 = vpack.c.bf16 %v1371_v12, %v1371_v12  ;;  %v1308_v18 = vadd.f32 %v2820_v27, %v1237_v14  ;;  %v1135_v19 = vld [vmem:[#allocation2 + $0xf8] sm:$0xff] }
 0x170   :  { %v1167_v20 = vld [vmem:[#allocation2 + $0x1f8] sm:$0xff]  ;;  %1660 = vst.msk [vmem:[%s2952_s4 + $0x74] sm:$0xf] %vm1630_vm4, %v1900_v15  ;;  %v1340_v21 = vmax.f32 %v1276_v17, 0.0  ;;  %v1206_v23 = vmul.f32 %v2811_v37, %v1135_v19 }
 0x171   :  { %1692 = vst.msk [vmem:[%s2952_s4 + $0xf4] sm:$0xf] %vm1630_vm4, %v1932_v16  ;;  %v1372_v22 = vmax.f32 %v1308_v18, 0.0  ;;  %v1238_v24 = vmul.f32 %v2811_v37, %v1167_v20 }
 0x172   :  { %v1901_v25 = vpack.c.bf16 %v1340_v21, %v1340_v21  ;;  %v1277_v28 = vadd.f32 %v2820_v27, %v1206_v23 }
 0x173   :  { %v1933_v26 = vpack.c.bf16 %v1372_v22, %v1372_v22  ;;  %v1309_v29 = vadd.f32 %v2820_v27, %v1238_v24 }
 0x174   :  { %1661 = vst.msk [vmem:[%s2952_s4 + $0x78] sm:$0xf] %vm1630_vm4, %v1901_v25  ;;  %v1341_v30 = vmax.f32 %v1277_v28, 0.0 }
 0x175   :  { %1693 = vst.msk [vmem:[%s2952_s4 + $0xf8] sm:$0xf] %vm1630_vm4, %v1933_v26  ;;  %v1373_v31 = vmax.f32 %v1309_v29, 0.0 }
 0x176   :  { %v1902_v32 = vpack.c.bf16 %v1341_v30, %v1341_v30 }
 0x177   :  { %v1934_v37 = vpack.c.bf16 %v1373_v31, %v1373_v31 }
 0x178   :  { %1662 = vst.msk [vmem:[%s2952_s4 + $0x7c] sm:$0xf] %vm1630_vm4, %v1902_v32 }
 0x179   :  { %1694 = vst.msk [vmem:[%s2952_s4 + $0xfc] sm:$0xf] %vm1630_vm4, %v1934_v37 }

</bundles_post_ra>
